<compile_context>
chip_gen: v7x
topology: tpu7x:2x2x1
jax: 0.10.0
libtpu: 0.0.40
codegen_flags: <defaults>
</compile_context>

<pallas_src>
import jax
import jax.numpy as jnp
from jax.experimental import pallas as pl
from jax.experimental.pallas import tpu as pltpu


def tail_kernel(x_ref, w1_ref, b1_ref, w2_ref, b2_ref, w3t_ref, b3_ref, o_ref):
    # fc1: (TM, 2048) @ (2048, 512) + (1, 512)  -- bf16 in, f32 accumulate (MXU)
    h1 = jnp.dot(x_ref[...], w1_ref[...],
                 preferred_element_type=jnp.float32) + b1_ref[...]
    # fc2: (TM, 512) @ (512, 64) + (1, 64)
    h2 = jnp.dot(h1.astype(jnp.bfloat16), w2_ref[...],
                 preferred_element_type=jnp.float32) + b2_ref[...]
    # fc3: N=1 output -> multiply + lane-reduce on VPU/XLU instead of a
    # 1-lane MXU matmul.
    o_ref[...] = (jnp.sum(h2 * w3t_ref[...], axis=-1, keepdims=True)
                  + b3_ref[...]).astype(o_ref.dtype)


def tail_forward(x, w1, b1, w2, b2, w3, b3, *, tm=1024):
    B = x.shape[0]

    # bf16 for the big MXU operands (halves HBM bytes); biases / final weight
    # column stay f32 (tiny, and keeps bias adds + reduction in f32).
    x_bf = x.astype(jnp.bfloat16)
    w1_bf = w1.astype(jnp.bfloat16)
    w2_bf = w2.astype(jnp.bfloat16)
    w3t = w3.reshape(1, 64).astype(jnp.float32)   # (64,1) -> (1,64)
    b1f = b1.astype(jnp.float32)
    b2f = b2.astype(jnp.float32)
    b3f = b3.astype(jnp.float32)

    # Batch tile: multiple of 8 (f32/bf16 sublane friendly), clamped to the
    # (padded) batch.  TM=1024 keeps the whole working set ~15 MB of VMEM,
    # safe on v7x's 64 MiB while big enough to amortize per-step overhead on
    # v5e/v6e.
    tm = max(8, min(tm, pl.cdiv(B, 8) * 8))
    bp = pl.cdiv(B, tm) * tm
    if bp != B:
        x_bf = jnp.pad(x_bf, ((0, bp - B), (0, 0)))   # zero rows, sliced off below
    nb = bp // tm

    flops = 2 * B * (2048 * 512 + 512 * 64 + 64)
    bytes_accessed = (x_bf.size * 2 + w1_bf.size * 2 + w2_bf.size * 2
                      + b1f.size * 4 + b2f.size * 4 + w3t.size * 4
                      + b3f.size * 4 + bp * 1 * 4)

    grid_spec = pltpu.PrefetchScalarGridSpec(
        num_scalar_prefetch=0,
        grid=(nb,),
        in_specs=[
            pl.BlockSpec((tm, 2048), lambda i: (i, 0)),      # x tile (streamed)
            pl.BlockSpec((2048, 512), lambda i: (0, 0)),     # W1 (VMEM-resident)
            pl.BlockSpec((1, 512), lambda i: (0, 0)),        # b1
            pl.BlockSpec((512, 64), lambda i: (0, 0)),       # W2
            pl.BlockSpec((1, 64), lambda i: (0, 0)),         # b2
            pl.BlockSpec((1, 64), lambda i: (0, 0)),         # w3^T
            pl.BlockSpec((1, 1), lambda i: (0, 0)),          # b3
        ],
        out_specs=pl.BlockSpec((tm, 1), lambda i: (i, 0)),
    )

    out = pl.pallas_call(
        tail_kernel,
        out_shape=jax.ShapeDtypeStruct((bp, 1), jnp.float32),
        grid_spec=grid_spec,
        compiler_params=pltpu.CompilerParams(
            dimension_semantics=("parallel",)),
        cost_estimate=pl.CostEstimate(
            flops=flops, transcendentals=0, bytes_accessed=bytes_accessed),
    )(x_bf, w1_bf, b1f, w2_bf, b2f, w3t, b3f)

    return out[:B]


def init_params(key):
    # Deterministic synthetic init mimicking nn.Linear's U(-1/sqrt(in), 1/sqrt(in)).
    k = jax.random.split(key, 6)

    def linear(kw, kb, fan_in, fan_out):
        bound = 1.0 / jnp.sqrt(fan_in)
        w = jax.random.uniform(kw, (fan_in, fan_out), jnp.float32, -bound, bound)
        b = jax.random.uniform(kb, (1, fan_out), jnp.float32, -bound, bound)
        return w, b

    w1, b1 = linear(k[0], k[1], 2048, 512)
    w2, b2 = linear(k[2], k[3], 512, 64)
    w3, b3 = linear(k[4], k[5], 64, 1)
    return w1, b1, w2, b2, w3, b3


if __name__ == "__main__":
    key = jax.random.PRNGKey(0)
    kx, kp = jax.random.split(key)

    B = 8  # small demo batch
    x = jax.random.normal(kx, (B, 2048), jnp.float32)
    w1, b1, w2, b2, w3, b3 = init_params(kp)

    out = jax.block_until_ready(tail_forward(x, w1, b1, w2, b2, w3, b3))
    assert out.shape == (B, 1), out.shape

    # Reference 1 (tight): identical bf16-weight / f32-accumulate path in plain JAX.
    xb = x.astype(jnp.bfloat16)
    w1b = w1.astype(jnp.bfloat16)
    w2b = w2.astype(jnp.bfloat16)
    h1 = jnp.dot(xb, w1b, preferred_element_type=jnp.float32) + b1
    h2 = jnp.dot(h1.astype(jnp.bfloat16), w2b, preferred_element_type=jnp.float32) + b2
    ref_bf16 = jnp.sum(h2 * w3.reshape(1, 64), axis=-1, keepdims=True) + b3
    assert jnp.allclose(out, ref_bf16, atol=2e-3, rtol=2e-3), "mismatch vs bf16-path reference"

    # Reference 2 (loose): pure f32 PyTorch-equivalent forward (bf16 quantization error).
    ref_f32 = ((x @ w1 + b1) @ w2 + b2) @ w3 + b3
    assert jnp.allclose(out, ref_f32, atol=5e-2, rtol=5e-2), "mismatch vs f32 reference"

    print("KERNEL_OK")
</pallas_src>

<mosaic_0001>
module attributes {stable_mosaic.version = 11 : i64} {
  func.func @tail_kernel(%arg0: i32, %arg1: memref<8x2048xbf16, #tpu.memory_space<vmem>>, %arg2: memref<2048x512xbf16, #tpu.memory_space<vmem>>, %arg3: memref<1x512xf32, #tpu.memory_space<vmem>>, %arg4: memref<512x64xbf16, #tpu.memory_space<vmem>>, %arg5: memref<1x64xf32, #tpu.memory_space<vmem>>, %arg6: memref<1x64xf32, #tpu.memory_space<vmem>>, %arg7: memref<1x1xf32, #tpu.memory_space<vmem>>, %arg8: memref<8x1xf32, #tpu.memory_space<vmem>>) attributes {dimension_semantics = [#tpu.dimension_semantics<parallel>], iteration_bounds = array<i64: 1>, scalar_prefetch = 0 : i64, scratch_operands = 0 : i64, tpu.core_type = #tpu.core_type<tc>, window_params = [{transform_indices = @transform_0, window_bounds = array<i64: 8, 2048>}, {pipeline_mode = #tpu.pipeline_mode<synchronous>, transform_indices = @transform_1, window_bounds = array<i64: 2048, 512>}, {pipeline_mode = #tpu.pipeline_mode<synchronous>, transform_indices = @transform_2, window_bounds = array<i64: 1, 512>}, {pipeline_mode = #tpu.pipeline_mode<synchronous>, transform_indices = @transform_3, window_bounds = array<i64: 512, 64>}, {pipeline_mode = #tpu.pipeline_mode<synchronous>, transform_indices = @transform_4, window_bounds = array<i64: 1, 64>}, {pipeline_mode = #tpu.pipeline_mode<synchronous>, transform_indices = @transform_5, window_bounds = array<i64: 1, 64>}, {pipeline_mode = #tpu.pipeline_mode<synchronous>, transform_indices = @transform_6, window_bounds = array<i64: 1, 1>}, {transform_indices = @transform_7, window_bounds = array<i64: 8, 1>}]} {
    %c0 = arith.constant 0 : index
    %c0_0 = arith.constant 0 : index
    %0 = vector.load %arg1[%c0, %c0_0] : memref<8x2048xbf16, #tpu.memory_space<vmem>>, vector<8x2048xbf16>
    %c0_1 = arith.constant 0 : index
    %c0_2 = arith.constant 0 : index
    %1 = vector.load %arg2[%c0_1, %c0_2] : memref<2048x512xbf16, #tpu.memory_space<vmem>>, vector<2048x512xbf16>
    %cst = arith.constant dense<0.000000e+00> : vector<8x512xf32>
    %2 = tpu.matmul %0, %1, %cst {dimension_numbers = #tpu.dot_dimension_numbers<[1], [0], [0], [1], [0, 0, 1, 1], [], []>} : vector<8x2048xbf16>, vector<2048x512xbf16>, vector<8x512xf32> -> vector<8x512xf32>
    %c0_3 = arith.constant 0 : index
    %c0_4 = arith.constant 0 : index
    %3 = vector.load %arg3[%c0_3, %c0_4] : memref<1x512xf32, #tpu.memory_space<vmem>>, vector<1x512xf32>
    %4 = vector.broadcast %3 : vector<1x512xf32> to vector<8x512xf32>
    %5 = arith.addf %2, %4 : vector<8x512xf32>
    %6 = arith.truncf %5 : vector<8x512xf32> to vector<8x512xbf16>
    %c0_5 = arith.constant 0 : index
    %c0_6 = arith.constant 0 : index
    %7 = vector.load %arg4[%c0_5, %c0_6] : memref<512x64xbf16, #tpu.memory_space<vmem>>, vector<512x64xbf16>
    %cst_7 = arith.constant dense<0.000000e+00> : vector<8x64xf32>
    %8 = tpu.matmul %6, %7, %cst_7 {dimension_numbers = #tpu.dot_dimension_numbers<[1], [0], [0], [1], [0, 0, 1, 1], [], []>} : vector<8x512xbf16>, vector<512x64xbf16>, vector<8x64xf32> -> vector<8x64xf32>
    %c0_8 = arith.constant 0 : index
    %c0_9 = arith.constant 0 : index
    %9 = vector.load %arg5[%c0_8, %c0_9] : memref<1x64xf32, #tpu.memory_space<vmem>>, vector<1x64xf32>
    %10 = vector.broadcast %9 : vector<1x64xf32> to vector<8x64xf32>
    %11 = arith.addf %8, %10 : vector<8x64xf32>
    %c0_10 = arith.constant 0 : index
    %c0_11 = arith.constant 0 : index
    %12 = vector.load %arg6[%c0_10, %c0_11] : memref<1x64xf32, #tpu.memory_space<vmem>>, vector<1x64xf32>
    %13 = vector.broadcast %12 : vector<1x64xf32> to vector<8x64xf32>
    %14 = arith.mulf %11, %13 : vector<8x64xf32>
    %cst_12 = arith.constant dense<0.000000e+00> : vector<8xf32>
    %15 = vector.multi_reduction <add>, %14, %cst_12 [1] : vector<8x64xf32> to vector<8xf32>
    %16 = vector.shape_cast %15 : vector<8xf32> to vector<8x1xf32>
    %c0_13 = arith.constant 0 : index
    %c0_14 = arith.constant 0 : index
    %17 = vector.load %arg7[%c0_13, %c0_14] : memref<1x1xf32, #tpu.memory_space<vmem>>, vector<1x1xf32>
    %18 = vector.broadcast %17 : vector<1x1xf32> to vector<8x1xf32>
    %19 = arith.addf %16, %18 : vector<8x1xf32>
    %c0_15 = arith.constant 0 : index
    %c0_16 = arith.constant 0 : index
    %20 = vector.load %arg8[%c0_15, %c0_16] : memref<8x1xf32, #tpu.memory_space<vmem>>, vector<8x1xf32>
    tpu.vector_store %arg8[%c0_15, %c0_16], %19 {strides = array<i32>} : memref<8x1xf32, #tpu.memory_space<vmem>>, vector<8x1xf32>,
    return
  }
  func.func @transform_0(%arg0: i32) -> (i32, i32) {
    %c0_i32 = arith.constant 0 : i32
    %c0_i32_0 = arith.constant 0 : i32
    return %arg0, %c0_i32 : i32, i32
  }
  func.func @transform_1(%arg0: i32) -> (i32, i32) {
    %c0_i32 = arith.constant 0 : i32
    %c0_i32_0 = arith.constant 0 : i32
    %c0_i32_1 = arith.constant 0 : i32
    return %c0_i32, %c0_i32_0 : i32, i32
  }
  func.func @transform_2(%arg0: i32) -> (i32, i32) {
    %c0_i32 = arith.constant 0 : i32
    %c0_i32_0 = arith.constant 0 : i32
    %c0_i32_1 = arith.constant 0 : i32
    return %c0_i32, %c0_i32_0 : i32, i32
  }
  func.func @transform_3(%arg0: i32) -> (i32, i32) {
    %c0_i32 = arith.constant 0 : i32
    %c0_i32_0 = arith.constant 0 : i32
    %c0_i32_1 = arith.constant 0 : i32
    return %c0_i32, %c0_i32_0 : i32, i32
  }
  func.func @transform_4(%arg0: i32) -> (i32, i32) {
    %c0_i32 = arith.constant 0 : i32
    %c0_i32_0 = arith.constant 0 : i32
    %c0_i32_1 = arith.constant 0 : i32
    return %c0_i32, %c0_i32_0 : i32, i32
  }
  func.func @transform_5(%arg0: i32) -> (i32, i32) {
    %c0_i32 = arith.constant 0 : i32
    %c0_i32_0 = arith.constant 0 : i32
    %c0_i32_1 = arith.constant 0 : i32
    return %c0_i32, %c0_i32_0 : i32, i32
  }
  func.func @transform_6(%arg0: i32) -> (i32, i32) {
    %c0_i32 = arith.constant 0 : i32
    %c0_i32_0 = arith.constant 0 : i32
    %c0_i32_1 = arith.constant 0 : i32
    return %c0_i32, %c0_i32_0 : i32, i32
  }
  func.func @transform_7(%arg0: i32) -> (i32, i32) {
    %c0_i32 = arith.constant 0 : i32
    %c0_i32_0 = arith.constant 0 : i32
    return %arg0, %c0_i32 : i32, i32
  }
}

</mosaic_0001>

<bundles_post_ra>
// kernel: tpu_custom_call.1
= control target key start
LH: loop header
LB: loop body
LE: loop exit
PB: predicated region body
PF: predicated region fallthrough
CT: control target
= control target key end

     0   :  { %s6136_s0 = inlined_call_operand.hbm [shape: bf16[8,2048], index: 0, kind: input, shape index: {}]   ;;  %s6137_s1 = inlined_call_operand.hbm [shape: bf16[2048,512], index: 1, kind: input, shape index: {}]   ;;  %s6138_s2 = inlined_call_operand.hbm [shape: f32[1,512], index: 2, kind: input, shape index: {}]   ;;  %s6139_s3 = inlined_call_operand.vmem [shape: bf16[512,64], index: 3, kind: input, shape index: {}]   ;;  %s6140_s4 = inlined_call_operand.hbm [shape: f32[1,64], index: 4, kind: input, shape index: {}]   ;;  %s6141_s5 = inlined_call_operand.hbm [shape: f32[1,64], index: 5, kind: input, shape index: {}]   ;;  %s6142_s6 = inlined_call_operand.<no memory space> [shape: f32[1,1], index: 6, kind: input, shape index: {}]   ;;  %s6143_s7 = inlined_call_operand.vmem [shape: f32[8,1], index: 7, kind: output, shape index: {}]  }
   0x1   :  { %v12_v0 = vstv %s6142_s6 }
   0x2   :  { %13 = vst [vmem:[#allocation2] sm:$0x1] %v12_v0 }
   0x3   :  { %14 = vsyncpa [#allocation4], 0 }
   0x4   :  { %15 = vsyncpa [#allocation6], 0 }
   0x5   :  { %16 = vsyncpa [#allocation9], 0  ;;  %s5885_s26 = smov [#allocation5]   ;;  %s5769_s30 = scalar_lea.hbm %s6137_s1, 65536 }
   0x6   :  { %s32_s27 = sshll.u32 %s5885_s26, 4  ;;  %p5770_p0 = scmp.ne.s32.totalorder %s6137_s1, %s5769_s30  ;;  %s33_s27 = int_to_ptr.vmem [resolvable:$true] %s32_s27 }
   0x7   :  { %p5773_p1 = scmp.lt.u32.totalorder %s5769_s30, %s6137_s1 }
   0x9   :  { %p5775_p2 = pnand %p5773_p1, %p5770_p0 }
   0xb   :  { %5778 = shalt.err (!%p5775_p2)
}
   0xc   :  { %s5779_s6 = scalar_lea.vmem %s33_s27, 65536  ;;  %p5784_p4 = scmp.lt.s32.totalorder %s33_s27, %s33_s27 }
   0xd   :  { %p5780_p3 = scmp.ne.s32.totalorder %s33_s27, %s5779_s6  ;;  %p5785_p5 = scmp.lt.s32.totalorder %s5779_s6, %s5779_s6 }
   0xf   :  { %p5786_p6 = por %p5785_p5, %p5784_p4 }
  0x11   :  { %p5787_p7 = pnand %p5786_p6, %p5780_p3 }
  0x13   :  { %5790 = shalt.err (!%p5787_p7)
}
  0x14   :  { %s5886_s12 = smov 256   ;;  %s5887_s13 = smov 16  }
  0x15   :  { %38 = dma.hbm_to_vmem [thread:$0]  %s6137_s1, 65536, %s33_s27, [#allocation6], %s5886_s12, %s5886_s12, %s5887_s13  }
  0x16   :  { %s5888_s16 = smov [#allocation8]   ;;  %s5889_s18 = smov [#allocation3]  }
  0x17   :  { %s57_s17 = sshll.u32 %s5888_s16, 4  ;;  %s23_s19 = sshll.u32 %s5889_s18, 4  ;;  %s58_s17 = int_to_ptr.vmem [resolvable:$true] %s57_s17  ;;  %s24_s19 = int_to_ptr.vmem [resolvable:$true] %s23_s19 }
  0x18   :  { %s5791_s22 = scalar_lea.hbm %s6140_s4, 16 }
  0x19   :  { %p5792_p8 = scmp.ne.s32.totalorder %s6140_s4, %s5791_s22  ;;  %p5795_p9 = scmp.lt.u32.totalorder %s5791_s22, %s6140_s4 }
  0x1b   :  { %p5797_p10 = pnand %p5795_p9, %p5792_p8 }
  0x1d   :  { %5800 = shalt.err (!%p5797_p10)
}
  0x1e   :  { %s5801_s1 = scalar_lea.vmem %s58_s17, 16  ;;  %s5805_s27 = scalar_lea.vmem %s58_s17, 32 }
  0x1f   :  { %p5802_p11 = scmp.ne.s32.totalorder %s58_s17, %s5801_s1  ;;  %p5806_p12 = scmp.lt.s32.totalorder %s58_s17, %s58_s17 }
  0x20   :  { %p5807_p13 = scmp.lt.s32.totalorder %s5805_s27, %s5801_s1 }
  0x22   :  { %p5808_p0 = por %p5807_p13, %p5806_p12 }
  0x24   :  { %p5809_p1 = pnand %p5808_p0, %p5802_p11 }
  0x26   :  { %5812 = shalt.err (!%p5809_p1)
}
  0x27   :  { %60 = dma.hbm_to_vmem [thread:$0]  %s6140_s4, 16, %s58_s17, [#allocation9]  }
  0x28   :  { %s5813_s9 = scalar_lea.hbm %s6136_s0, 1024 }
  0x29   :  { %p5814_p2 = scmp.ne.s32.totalorder %s6136_s0, %s5813_s9  ;;  %p5817_p3 = scmp.lt.u32.totalorder %s5813_s9, %s6136_s0 }
  0x2b   :  { %p5819_p4 = pnand %p5817_p3, %p5814_p2 }
  0x2d   :  { %5822 = shalt.err (!%p5819_p4)
}
  0x2e   :  { %s5823_s13 = scalar_lea.vmem %s24_s19, 1024  ;;  %p5828_p6 = scmp.lt.s32.totalorder %s24_s19, %s24_s19 }
  0x2f   :  { %p5824_p5 = scmp.ne.s32.totalorder %s24_s19, %s5823_s13  ;;  %p5829_p7 = scmp.lt.s32.totalorder %s5823_s13, %s5823_s13 }
  0x31   :  { %p5830_p8 = por %p5829_p7, %p5828_p6 }
  0x33   :  { %p5831_p9 = pnand %p5830_p8, %p5824_p5 }
  0x35   :  { %5834 = shalt.err (!%p5831_p9)
}
  0x36   :  { %26 = dma.hbm_to_vmem [thread:$0]  %s6136_s0, 1024, %s24_s19, [#allocation4]  }
  0x37   :  { %s5890_s15 = smov [#allocation7]   ;;  %s5891_s17 = smov [#allocation10]  }
  0x38   :  { %s45_s16 = sshll.u32 %s5890_s15, 4  ;;  %s67_s18 = sshll.u32 %s5891_s17, 4  ;;  %s46_s16 = int_to_ptr.vmem [resolvable:$true] %s45_s16  ;;  %s68_s18 = int_to_ptr.vmem [resolvable:$true] %s67_s18 }
  0x39   :  { %s5835_s22 = scalar_lea.hbm %s6138_s2, 64 }
  0x3a   :  { %p5836_p10 = scmp.ne.s32.totalorder %s6138_s2, %s5835_s22  ;;  %p5839_p11 = scmp.lt.u32.totalorder %s5835_s22, %s6138_s2 }
  0x3c   :  { %p5841_p12 = pnand %p5839_p11, %p5836_p10 }
  0x3e   :  { %5844 = shalt.err (!%p5841_p12)
}
  0x3f   :  { %s5845_s0 = scalar_lea.vmem %s46_s16, 64  ;;  %p5850_p0 = scmp.lt.s32.totalorder %s46_s16, %s46_s16 }
  0x40   :  { %p5846_p13 = scmp.ne.s32.totalorder %s46_s16, %s5845_s0  ;;  %p5851_p1 = scmp.lt.s32.totalorder %s5845_s0, %s5845_s0 }
  0x42   :  { %p5852_p2 = por %p5851_p1, %p5850_p0 }
  0x44   :  { %p5853_p3 = pnand %p5852_p2, %p5846_p13 }
  0x46   :  { %5856 = shalt.err (!%p5853_p3)
}
  0x47   :  { %48 = dma.hbm_to_vmem [thread:$0]  %s6138_s2, 64, %s46_s16, [#allocation6]  }
  0x48   :  { %s5857_s29 = scalar_lea.hbm %s6141_s5, 16 }
  0x49   :  { %p5858_p4 = scmp.ne.s32.totalorder %s6141_s5, %s5857_s29  ;;  %p5861_p5 = scmp.lt.u32.totalorder %s5857_s29, %s6141_s5 }
  0x4b   :  { %p5863_p6 = pnand %p5861_p5, %p5858_p4 }
  0x4d   :  { %5866 = shalt.err (!%p5863_p6)
}
  0x4e   :  { %s5867_s11 = scalar_lea.vmem %s68_s18, 16  ;;  %s5871_s6 = scalar_lea.vmem %s68_s18, 32 }
  0x4f   :  { %p5868_p7 = scmp.ne.s32.totalorder %s68_s18, %s5867_s11  ;;  %p5872_p8 = scmp.lt.s32.totalorder %s68_s18, %s68_s18 }
  0x50   :  { %p5873_p9 = scmp.lt.s32.totalorder %s5871_s6, %s5867_s11 }
  0x52   :  { %p5874_p10 = por %p5873_p9, %p5872_p8 }
  0x54   :  { %p5875_p11 = pnand %p5874_p10, %p5868_p7 }
  0x56   :  { %5878 = shalt.err (!%p5875_p11)
}
  0x57   :  { %70 = dma.hbm_to_vmem [thread:$0]  %s6141_s5, 16, %s68_s18, [#allocation9]  }
  0x58   :  { %5879 = dma.done.wait [#allocation4], 1024  }
  0x59   :  { %5880 = vsyncadd [#allocation4], 4294966272 }
  0x5a   :  { %5881 = dma.done.wait [#allocation6], 65600  }
  0x5b   :  { %5882 = vsyncadd [#allocation6], 4294901696 }
  0x5c   :  { %5883 = dma.done.wait [#allocation9], 32  }
  0x5d   :  { %5884 = vsyncadd [#allocation9], 4294967264  ;;  %v4953_v1 = vld [vmem:[#allocation5 + $0x4] ss:$16 sps:$4 sm:$0xff]   ;;  %v4955_v2 = vld [vmem:[#allocation5 + $0xc] ss:$16 sps:$4 sm:$0xff]  }
  0x5e   :  { %3247 = vmatprep.subr.bf16.mxu0 %v4953_v1  ;;  %v4957_v3 = vld [vmem:[#allocation5] ss:$16 sps:$4 sm:$0xff]   ;;  %v4958_v4 = vld [vmem:[#allocation5 + $0x8] ss:$16 sps:$4 sm:$0xff]   ;;  %3575 = vmatprep.subr.bf16.mxu1 %v4955_v2  ;;  %v4959_v5 = vld [vmem:[#allocation5 + $0x24] ss:$16 sps:$4 sm:$0xff]  }
  0x5f   :  { %3248 = vmatpush1.bf16.msra.mxu0 %v4957_v3  ;;  %3576 = vmatpush1.bf16.msra.mxu1 %v4958_v4  ;;  %v4961_v6 = vld [vmem:[#allocation5 + $0x2c] ss:$16 sps:$4 sm:$0xff]   ;;  %v4963_v7 = vld [vmem:[#allocation5 + $0x20] ss:$16 sps:$4 sm:$0xff]   ;;  %v4964_v8 = vld [vmem:[#allocation5 + $0x28] ss:$16 sps:$4 sm:$0xff]  }
  0x60   :  { %3249 = vmatprep.subr.bf16.mxu0 %v4959_v5  ;;  %3577 = vmatprep.subr.bf16.mxu1 %v4961_v6  ;;  %v4965_v9 = vld [vmem:[#allocation5 + $0x44] ss:$16 sps:$4 sm:$0xff]   ;;  %v4967_v10 = vld [vmem:[#allocation5 + $0x4c] ss:$16 sps:$4 sm:$0xff]   ;;  %v4969_v11 = vld [vmem:[#allocation5 + $0x40] ss:$16 sps:$4 sm:$0xff]  }
  0x61   :  { %v4970_v12 = vld [vmem:[#allocation5 + $0x48] ss:$16 sps:$4 sm:$0xff]   ;;  %v4971_v13 = vld [vmem:[#allocation5 + $0x64] ss:$16 sps:$4 sm:$0xff]   ;;  %v4973_v14 = vld [vmem:[#allocation5 + $0x6c] ss:$16 sps:$4 sm:$0xff]  }
  0x62   :  { %v4975_v15 = vld [vmem:[#allocation5 + $0x60] ss:$16 sps:$4 sm:$0xff]   ;;  %v4976_v16 = vld [vmem:[#allocation5 + $0x68] ss:$16 sps:$4 sm:$0xff]   ;;  %v4977_v17 = vld [vmem:[#allocation5 + $0x84] ss:$16 sps:$4 sm:$0xff]  }
  0x63   :  { %3250 = vmatpush1.bf16.msra.mxu0 %v4963_v7  ;;  %3578 = vmatpush1.bf16.msra.mxu1 %v4964_v8  ;;  %v4979_v18 = vld [vmem:[#allocation5 + $0x8c] ss:$16 sps:$4 sm:$0xff]   ;;  %v4981_v19 = vld [vmem:[#allocation5 + $0x80] ss:$16 sps:$4 sm:$0xff]   ;;  %v4982_v20 = vld [vmem:[#allocation5 + $0x88] ss:$16 sps:$4 sm:$0xff]  }
  0x64   :  { %3251 = vmatprep.subr.bf16.mxu0 %v4965_v9  ;;  %3579 = vmatprep.subr.bf16.mxu1 %v4967_v10  ;;  %v4983_v21 = vld [vmem:[#allocation5 + $0xa4] ss:$16 sps:$4 sm:$0xff]   ;;  %v4985_v22 = vld [vmem:[#allocation5 + $0xac] ss:$16 sps:$4 sm:$0xff]   ;;  %v4987_v23 = vld [vmem:[#allocation5 + $0xa0] ss:$16 sps:$4 sm:$0xff]  }
  0x65   :  { %v4988_v24 = vld [vmem:[#allocation5 + $0xa8] ss:$16 sps:$4 sm:$0xff]   ;;  %v4989_v25 = vld [vmem:[#allocation5 + $0xc4] ss:$16 sps:$4 sm:$0xff]   ;;  %v4991_v26 = vld [vmem:[#allocation5 + $0xcc] ss:$16 sps:$4 sm:$0xff]  }
  0x66   :  { %v4993_v27 = vld [vmem:[#allocation5 + $0xc0] ss:$16 sps:$4 sm:$0xff]   ;;  %v4994_v28 = vld [vmem:[#allocation5 + $0xc8] ss:$16 sps:$4 sm:$0xff]   ;;  %v4995_v29 = vld [vmem:[#allocation5 + $0xe4] ss:$16 sps:$4 sm:$0xff]  }
  0x67   :  { %3252 = vmatpush1.bf16.msra.mxu0 %v4969_v11  ;;  %3580 = vmatpush1.bf16.msra.mxu1 %v4970_v12  ;;  %v4997_v30 = vld [vmem:[#allocation5 + $0xec] ss:$16 sps:$4 sm:$0xff]   ;;  %v4999_v31 = vld [vmem:[#allocation5 + $0xe0] ss:$16 sps:$4 sm:$0xff]   ;;  %v5000_v32 = vld [vmem:[#allocation5 + $0xe8] ss:$16 sps:$4 sm:$0xff]  }
  0x68   :  { %3253 = vmatprep.subr.bf16.mxu0 %v4971_v13  ;;  %3581 = vmatprep.subr.bf16.mxu1 %v4973_v14  ;;  %v5001_v33 = vld [vmem:[#allocation5 + $0x104] ss:$16 sps:$4 sm:$0xff]   ;;  %v5003_v34 = vld [vmem:[#allocation5 + $0x10c] ss:$16 sps:$4 sm:$0xff]   ;;  %v5005_v35 = vld [vmem:[#allocation5 + $0x100] ss:$16 sps:$4 sm:$0xff]  }
  0x69   :  { %v5006_v36 = vld [vmem:[#allocation5 + $0x108] ss:$16 sps:$4 sm:$0xff]   ;;  %v5007_v37 = vld [vmem:[#allocation5 + $0x124] ss:$16 sps:$4 sm:$0xff]   ;;  %v5009_v38 = vld [vmem:[#allocation5 + $0x12c] ss:$16 sps:$4 sm:$0xff]  }
  0x6a   :  { %v5011_v39 = vld [vmem:[#allocation5 + $0x120] ss:$16 sps:$4 sm:$0xff]   ;;  %v5012_v40 = vld [vmem:[#allocation5 + $0x128] ss:$16 sps:$4 sm:$0xff]   ;;  %v5013_v41 = vld [vmem:[#allocation5 + $0x144] ss:$16 sps:$4 sm:$0xff]  }
  0x6b   :  { %3254 = vmatpush1.bf16.msra.mxu0 %v4975_v15  ;;  %3582 = vmatpush1.bf16.msra.mxu1 %v4976_v16  ;;  %v5015_v42 = vld [vmem:[#allocation5 + $0x14c] ss:$16 sps:$4 sm:$0xff]   ;;  %v5017_v43 = vld [vmem:[#allocation5 + $0x140] ss:$16 sps:$4 sm:$0xff]   ;;  %v5018_v44 = vld [vmem:[#allocation5 + $0x148] ss:$16 sps:$4 sm:$0xff]  }
  0x6c   :  { %3255 = vmatprep.subr.bf16.mxu0 %v4977_v17  ;;  %3583 = vmatprep.subr.bf16.mxu1 %v4979_v18  ;;  %v5019_v45 = vld [vmem:[#allocation5 + $0x164] ss:$16 sps:$4 sm:$0xff]   ;;  %v5021_v46 = vld [vmem:[#allocation5 + $0x16c] ss:$16 sps:$4 sm:$0xff]   ;;  %v5023_v48 = vld [vmem:[#allocation5 + $0x160] ss:$16 sps:$4 sm:$0xff]  }
  0x6d   :  { %v89_v47 = vld [vmem:[#allocation3] sm:$0xff]  ;;  %v5024_v50 = vld [vmem:[#allocation5 + $0x168] ss:$16 sps:$4 sm:$0xff]   ;;  %v5027_v52 = vld [vmem:[#allocation5 + $0x18c] ss:$16 sps:$4 sm:$0xff]   ;;  %vm4258_vm0 = vcmask 523264  }
  0x6e   :  { %v4280_v49 = vcombine.high %v89_v47, %v89_v47  ;;  %v5025_v51 = vld [vmem:[#allocation5 + $0x184] ss:$16 sps:$4 sm:$0xff]   ;;  %v5029_v53 = vld [vmem:[#allocation5 + $0x180] ss:$16 sps:$4 sm:$0xff]   ;;  %v5030_v54 = vld [vmem:[#allocation5 + $0x188] ss:$16 sps:$4 sm:$0xff]   ;;  %v4279_v5 = vcombine.low %v89_v47, %v89_v47 }
  0x6f   :  { %3256 = vmatpush1.bf16.msra.mxu0 %v4981_v19  ;;  %3584 = vmatpush1.bf16.msra.mxu1 %v4982_v20  ;;  %v5031_v55 = vld [vmem:[#allocation5 + $0x1a4] ss:$16 sps:$4 sm:$0xff]   ;;  %v5033_v56 = vld [vmem:[#allocation5 + $0x1ac] ss:$16 sps:$4 sm:$0xff]   ;;  %v5035_v57 = vld [vmem:[#allocation5 + $0x1a0] ss:$16 sps:$4 sm:$0xff]  }
  0x70   :  { %3257 = vmatprep.subr.bf16.mxu0 %v4983_v21  ;;  %3585 = vmatprep.subr.bf16.mxu1 %v4985_v22  ;;  %v5036_v58 = vld [vmem:[#allocation5 + $0x1a8] ss:$16 sps:$4 sm:$0xff]   ;;  %v5037_v59 = vld [vmem:[#allocation5 + $0x1c4] ss:$16 sps:$4 sm:$0xff]   ;;  %v5039_v60 = vld [vmem:[#allocation5 + $0x1cc] ss:$16 sps:$4 sm:$0xff]  }
  0x71   :  { %3279 = vmatprep.mubr.bf16.mxu0 %v4280_v49  ;;  %3607 = vmatprep.mubr.bf16.mxu1 %v4280_v49  ;;  %v5041_v61 = vld [vmem:[#allocation5 + $0x1c0] ss:$16 sps:$4 sm:$0xff]   ;;  %v5042_v62 = vld [vmem:[#allocation5 + $0x1c8] ss:$16 sps:$4 sm:$0xff]   ;;  %v5043_v63 = vld [vmem:[#allocation5 + $0x1e4] ss:$16 sps:$4 sm:$0xff]  }
  0x72   :  { %v5045_v0 = vld [vmem:[#allocation5 + $0x1ec] ss:$16 sps:$4 sm:$0xff]   ;;  %v5047_v1 = vld [vmem:[#allocation5 + $0x1e0] ss:$16 sps:$4 sm:$0xff]   ;;  %v5048_v2 = vld [vmem:[#allocation5 + $0x1e8] ss:$16 sps:$4 sm:$0xff]  }
  0x73   :  { %3258 = vmatpush1.bf16.msra.mxu0 %v4987_v23  ;;  %3586 = vmatpush1.bf16.msra.mxu1 %v4988_v24  ;;  %v5053_v3 = vld [vmem:[#allocation5 + $0x204] ss:$16 sps:$4 sm:$0xff]   ;;  %v5056_v4 = vld [vmem:[#allocation5 + $0x20c] ss:$16 sps:$4 sm:$0xff]   ;;  %v5051_v6 = vld [vmem:[#allocation5 + $0x200] ss:$16 sps:$4 sm:$0xff]  }
  0x74   :  { %3259 = vmatprep.subr.bf16.mxu0 %v4989_v25  ;;  %3587 = vmatprep.subr.bf16.mxu1 %v4991_v26  ;;  %v5054_v7 = vld [vmem:[#allocation5 + $0x208] ss:$16 sps:$4 sm:$0xff]   ;;  %v5059_v8 = vld [vmem:[#allocation5 + $0x224] ss:$16 sps:$4 sm:$0xff]   ;;  %v5062_v9 = vld [vmem:[#allocation5 + $0x22c] ss:$16 sps:$4 sm:$0xff]  }
  0x75   :  { %v5057_v10 = vld [vmem:[#allocation5 + $0x220] ss:$16 sps:$4 sm:$0xff]   ;;  %v5060_v11 = vld [vmem:[#allocation5 + $0x228] ss:$16 sps:$4 sm:$0xff]   ;;  %v5065_v12 = vld [vmem:[#allocation5 + $0x244] ss:$16 sps:$4 sm:$0xff]  }
  0x76   :  { %v5068_v13 = vld [vmem:[#allocation5 + $0x24c] ss:$16 sps:$4 sm:$0xff]   ;;  %v5063_v14 = vld [vmem:[#allocation5 + $0x240] ss:$16 sps:$4 sm:$0xff]   ;;  %v5066_v15 = vld [vmem:[#allocation5 + $0x248] ss:$16 sps:$4 sm:$0xff]  }
  0x77   :  { %3260 = vmatpush1.bf16.msra.mxu0 %v4993_v27  ;;  %3588 = vmatpush1.bf16.msra.mxu1 %v4994_v28  ;;  %v5071_v16 = vld [vmem:[#allocation5 + $0x264] ss:$16 sps:$4 sm:$0xff]   ;;  %v5074_v17 = vld [vmem:[#allocation5 + $0x26c] ss:$16 sps:$4 sm:$0xff]   ;;  %v5069_v18 = vld [vmem:[#allocation5 + $0x260] ss:$16 sps:$4 sm:$0xff]  }
  0x78   :  { %3261 = vmatprep.subr.bf16.mxu0 %v4995_v29  ;;  %3589 = vmatprep.subr.bf16.mxu1 %v4997_v30  ;;  %v5072_v19 = vld [vmem:[#allocation5 + $0x268] ss:$16 sps:$4 sm:$0xff]   ;;  %v5077_v20 = vld [vmem:[#allocation5 + $0x284] ss:$16 sps:$4 sm:$0xff]   ;;  %v5080_v21 = vld [vmem:[#allocation5 + $0x28c] ss:$16 sps:$4 sm:$0xff]  }
  0x79   :  { %v5075_v22 = vld [vmem:[#allocation5 + $0x280] ss:$16 sps:$4 sm:$0xff]   ;;  %v5078_v23 = vld [vmem:[#allocation5 + $0x288] ss:$16 sps:$4 sm:$0xff]   ;;  %v5083_v24 = vld [vmem:[#allocation5 + $0x2a4] ss:$16 sps:$4 sm:$0xff]  }
  0x7a   :  { %v5086_v25 = vld [vmem:[#allocation5 + $0x2ac] ss:$16 sps:$4 sm:$0xff]   ;;  %v5081_v26 = vld [vmem:[#allocation5 + $0x2a0] ss:$16 sps:$4 sm:$0xff]   ;;  %v5084_v27 = vld [vmem:[#allocation5 + $0x2a8] ss:$16 sps:$4 sm:$0xff]  }
  0x7b   :  { %3262 = vmatpush1.bf16.msra.mxu0 %v4999_v31  ;;  %3590 = vmatpush1.bf16.msra.mxu1 %v5000_v32  ;;  %v5089_v28 = vld [vmem:[#allocation5 + $0x2c4] ss:$16 sps:$4 sm:$0xff]   ;;  %v5092_v29 = vld [vmem:[#allocation5 + $0x2cc] ss:$16 sps:$4 sm:$0xff]   ;;  %v5087_v32 = vld [vmem:[#allocation5 + $0x2c0] ss:$16 sps:$4 sm:$0xff]  }
  0x7c   :  { %3263 = vmatprep.subr.bf16.mxu0 %v5001_v33  ;;  %3591 = vmatprep.subr.bf16.mxu1 %v5003_v34  ;;  %v5995_v30 = vld [vmem:[#allocation3 + $0x8] sm:$0xff]  ;;  %v5095_v34 = vld [vmem:[#allocation5 + $0x2e4] ss:$16 sps:$4 sm:$0xff]   ;;  %vm4270_vm1 = vcmask 7168  }
  0x7d   :  { %v4282_v31 = vcombine.high %v5995_v30, %v5995_v30  ;;  %v5090_v33 = vld [vmem:[#allocation5 + $0x2c8] ss:$16 sps:$4 sm:$0xff]   ;;  %v5116_v47 = vld [vmem:[#allocation5 + $0x34c] ss:$16 sps:$4 sm:$0xff]  }
  0x7e   :  { %v5114_v49 = vld [vmem:[#allocation5 + $0x348] ss:$16 sps:$4 sm:$0xff]  }
  0x7f   :  { %3264 = vmatpush1.bf16.msra.mxu0 %v5005_v35  ;;  %3592 = vmatpush1.bf16.msra.mxu1 %v5006_v36  ;;  %v5098_v35 = vld [vmem:[#allocation5 + $0x2ec] ss:$16 sps:$4 sm:$0xff]   ;;  %v5093_v36 = vld [vmem:[#allocation5 + $0x2e0] ss:$16 sps:$4 sm:$0xff]  }
  0x80   :  { %3265 = vmatprep.subr.bf16.mxu0 %v5007_v37  ;;  %3593 = vmatprep.subr.bf16.mxu1 %v5009_v38  ;;  %v5096_v37 = vld [vmem:[#allocation5 + $0x2e8] ss:$16 sps:$4 sm:$0xff]   ;;  %v5101_v38 = vld [vmem:[#allocation5 + $0x304] ss:$16 sps:$4 sm:$0xff]  }
  0x83   :  { %3266 = vmatpush1.bf16.msra.mxu0 %v5011_v39  ;;  %3594 = vmatpush1.bf16.msra.mxu1 %v5012_v40  ;;  %v5104_v39 = vld [vmem:[#allocation5 + $0x30c] ss:$16 sps:$4 sm:$0xff]   ;;  %v5099_v40 = vld [vmem:[#allocation5 + $0x300] ss:$16 sps:$4 sm:$0xff]  }
  0x84   :  { %3267 = vmatprep.subr.bf16.mxu0 %v5013_v41  ;;  %3595 = vmatprep.subr.bf16.mxu1 %v5015_v42  ;;  %v5102_v41 = vld [vmem:[#allocation5 + $0x308] ss:$16 sps:$4 sm:$0xff]   ;;  %v5107_v42 = vld [vmem:[#allocation5 + $0x324] ss:$16 sps:$4 sm:$0xff]  }
  0x87   :  { %3268 = vmatpush1.bf16.msra.mxu0 %v5017_v43  ;;  %3596 = vmatpush1.bf16.msra.mxu1 %v5018_v44  ;;  %v5110_v43 = vld [vmem:[#allocation5 + $0x32c] ss:$16 sps:$4 sm:$0xff]   ;;  %v5105_v44 = vld [vmem:[#allocation5 + $0x320] ss:$16 sps:$4 sm:$0xff]  }
  0x88   :  { %3269 = vmatprep.subr.bf16.mxu0 %v5019_v45  ;;  %3597 = vmatprep.subr.bf16.mxu1 %v5021_v46  ;;  %v5108_v45 = vld [vmem:[#allocation5 + $0x328] ss:$16 sps:$4 sm:$0xff]   ;;  %v5113_v46 = vld [vmem:[#allocation5 + $0x344] ss:$16 sps:$4 sm:$0xff]  }
  0x8b   :  { %3270 = vmatpush1.bf16.msra.mxu0 %v5023_v48  ;;  %3598 = vmatpush1.bf16.msra.mxu1 %v5024_v50  ;;  %v5111_v48 = vld [vmem:[#allocation5 + $0x340] ss:$16 sps:$4 sm:$0xff]   ;;  %v5119_v50 = vld [vmem:[#allocation5 + $0x364] ss:$16 sps:$4 sm:$0xff]  }
  0x8c   :  { %3271 = vmatprep.subr.bf16.mxu0 %v5025_v51  ;;  %3599 = vmatprep.subr.bf16.mxu1 %v5027_v52  ;;  %v5122_v51 = vld [vmem:[#allocation5 + $0x36c] ss:$16 sps:$4 sm:$0xff]   ;;  %v5117_v52 = vld [vmem:[#allocation5 + $0x360] ss:$16 sps:$4 sm:$0xff]  }
  0x8f   :  { %3272 = vmatpush1.bf16.msra.mxu0 %v5029_v53  ;;  %3600 = vmatpush1.bf16.msra.mxu1 %v5030_v54  ;;  %v5120_v53 = vld [vmem:[#allocation5 + $0x368] ss:$16 sps:$4 sm:$0xff]   ;;  %v5125_v54 = vld [vmem:[#allocation5 + $0x384] ss:$16 sps:$4 sm:$0xff]  }
  0x90   :  { %3273 = vmatprep.subr.bf16.mxu0 %v5031_v55  ;;  %3601 = vmatprep.subr.bf16.mxu1 %v5033_v56  ;;  %v5128_v55 = vld [vmem:[#allocation5 + $0x38c] ss:$16 sps:$4 sm:$0xff]   ;;  %v5123_v56 = vld [vmem:[#allocation5 + $0x380] ss:$16 sps:$4 sm:$0xff]  }
  0x93   :  { %3274 = vmatpush1.bf16.msra.mxu0 %v5035_v57  ;;  %3602 = vmatpush1.bf16.msra.mxu1 %v5036_v58  ;;  %v5126_v57 = vld [vmem:[#allocation5 + $0x388] ss:$16 sps:$4 sm:$0xff]   ;;  %v5131_v58 = vld [vmem:[#allocation5 + $0x3a4] ss:$16 sps:$4 sm:$0xff]  }
  0x94   :  { %3275 = vmatprep.subr.bf16.mxu0 %v5037_v59  ;;  %3603 = vmatprep.subr.bf16.mxu1 %v5039_v60  ;;  %v5134_v59 = vld [vmem:[#allocation5 + $0x3ac] ss:$16 sps:$4 sm:$0xff]   ;;  %v5129_v60 = vld [vmem:[#allocation5 + $0x3a0] ss:$16 sps:$4 sm:$0xff]  }
  0x97   :  { %3276 = vmatpush1.bf16.msra.mxu0 %v5041_v61  ;;  %3604 = vmatpush1.bf16.msra.mxu1 %v5042_v62  ;;  %v5132_v61 = vld [vmem:[#allocation5 + $0x3a8] ss:$16 sps:$4 sm:$0xff]   ;;  %v5137_v62 = vld [vmem:[#allocation5 + $0x3c4] ss:$16 sps:$4 sm:$0xff]  }
  0x98   :  { %3277 = vmatprep.subr.bf16.mxu0 %v5043_v63  ;;  %3605 = vmatprep.subr.bf16.mxu1 %v5045_v0  ;;  %v5140_v63 = vld [vmem:[#allocation5 + $0x3cc] ss:$16 sps:$4 sm:$0xff]   ;;  %v5135_v0 = vld [vmem:[#allocation5 + $0x3c0] ss:$16 sps:$4 sm:$0xff]  }
  0x9b   :  { %3278 = vmatpush1.bf16.msra.mxu0 %v5047_v1  ;;  %3606 = vmatpush1.bf16.msra.mxu1 %v5048_v2  ;;  %v5138_v1 = vld [vmem:[#allocation5 + $0x3c8] ss:$16 sps:$4 sm:$0xff]   ;;  %v5143_v2 = vld [vmem:[#allocation5 + $0x3e4] ss:$16 sps:$4 sm:$0xff]  }
  0x9c   :  { %3288 = vmatprep.subr.bf16.mxu0 %v5053_v3  ;;  %3616 = vmatprep.subr.bf16.mxu1 %v5056_v4  ;;  %v5146_v3 = vld [vmem:[#allocation5 + $0x3ec] ss:$16 sps:$4 sm:$0xff]   ;;  %v5141_v4 = vld [vmem:[#allocation5 + $0x3e0] ss:$16 sps:$4 sm:$0xff]  }
  0x9e   :  { %3280 = vmatmul.mubr.bf16.vlgmr.msra.gmra.mrb[0].mxu0 %v4279_v5  ;;  %3608 = vmatmul.mubr.bf16.vlgmr.msra.gmra.mrb[0].mxu1 %v4279_v5  ;;  %v5144_v5 = vld [vmem:[#allocation5 + $0x3e8] ss:$16 sps:$4 sm:$0xff]  }
  0x9f   :  { %3289 = vmatpush1.bf16.msra.mxu0 %v5051_v6  ;;  %3617 = vmatpush1.bf16.msra.mxu1 %v5054_v7  ;;  %v5151_v6 = vld [vmem:[#allocation5 + $0x404] ss:$16 sps:$4 sm:$0xff]   ;;  %v5154_v7 = vld [vmem:[#allocation5 + $0x40c] ss:$16 sps:$4 sm:$0xff]  }
  0xa0   :  { %3290 = vmatprep.subr.bf16.mxu0 %v5059_v8  ;;  %3618 = vmatprep.subr.bf16.mxu1 %v5062_v9  ;;  %v4281_v8 = vcombine.low %v5995_v30, %v5995_v30  ;;  %v5149_v9 = vld [vmem:[#allocation5 + $0x400] ss:$16 sps:$4 sm:$0xff]   ;;  %v5184_v30 = vld [vmem:[#allocation5 + $0x4ac] ss:$16 sps:$4 sm:$0xff]  }
  0xa1   :  { %3320 = vmatprep.mubr.bf16.mxu0 %v4282_v31  ;;  %3648 = vmatprep.mubr.bf16.mxu1 %v4282_v31  ;;  %v5179_v31 = vld [vmem:[#allocation5 + $0x4a0] ss:$16 sps:$4 sm:$0xff]  }
  0xa3   :  { %3291 = vmatpush1.bf16.msra.mxu0 %v5057_v10  ;;  %3619 = vmatpush1.bf16.msra.mxu1 %v5060_v11  ;;  %v5152_v10 = vld [vmem:[#allocation5 + $0x408] ss:$16 sps:$4 sm:$0xff]   ;;  %v5157_v11 = vld [vmem:[#allocation5 + $0x424] ss:$16 sps:$4 sm:$0xff]  }
  0xa4   :  { %3292 = vmatprep.subr.bf16.mxu0 %v5065_v12  ;;  %3620 = vmatprep.subr.bf16.mxu1 %v5068_v13  ;;  %v6001_v12 = vld [vmem:[#allocation3 + $0x10] sm:$0xff]  ;;  %v5160_v13 = vld [vmem:[#allocation5 + $0x42c] ss:$16 sps:$4 sm:$0xff]  }
  0xa7   :  { %3293 = vmatpush1.bf16.msra.mxu0 %v5063_v14  ;;  %3621 = vmatpush1.bf16.msra.mxu1 %v5066_v15  ;;  %v4284_v14 = vcombine.high %v6001_v12, %v6001_v12  ;;  %v5155_v15 = vld [vmem:[#allocation5 + $0x420] ss:$16 sps:$4 sm:$0xff]  }
  0xa8   :  { %3294 = vmatprep.subr.bf16.mxu0 %v5071_v16  ;;  %3622 = vmatprep.subr.bf16.mxu1 %v5074_v17  ;;  %v5158_v16 = vld [vmem:[#allocation5 + $0x428] ss:$16 sps:$4 sm:$0xff]   ;;  %v5163_v17 = vld [vmem:[#allocation5 + $0x444] ss:$16 sps:$4 sm:$0xff]  }
  0xab   :  { %3295 = vmatpush1.bf16.msra.mxu0 %v5069_v18  ;;  %3623 = vmatpush1.bf16.msra.mxu1 %v5072_v19  ;;  %v5166_v18 = vld [vmem:[#allocation5 + $0x44c] ss:$16 sps:$4 sm:$0xff]   ;;  %v5161_v19 = vld [vmem:[#allocation5 + $0x440] ss:$16 sps:$4 sm:$0xff]  }
  0xac   :  { %3296 = vmatprep.subr.bf16.mxu0 %v5077_v20  ;;  %3624 = vmatprep.subr.bf16.mxu1 %v5080_v21  ;;  %v5164_v20 = vld [vmem:[#allocation5 + $0x448] ss:$16 sps:$4 sm:$0xff]   ;;  %v5169_v21 = vld [vmem:[#allocation5 + $0x464] ss:$16 sps:$4 sm:$0xff]  }
  0xaf   :  { %3297 = vmatpush1.bf16.msra.mxu0 %v5075_v22  ;;  %3625 = vmatpush1.bf16.msra.mxu1 %v5078_v23  ;;  %v5172_v22 = vld [vmem:[#allocation5 + $0x46c] ss:$16 sps:$4 sm:$0xff]   ;;  %v5167_v23 = vld [vmem:[#allocation5 + $0x460] ss:$16 sps:$4 sm:$0xff]  }
  0xb0   :  { %3298 = vmatprep.subr.bf16.mxu0 %v5083_v24  ;;  %3626 = vmatprep.subr.bf16.mxu1 %v5086_v25  ;;  %v5170_v24 = vld [vmem:[#allocation5 + $0x468] ss:$16 sps:$4 sm:$0xff]   ;;  %v5175_v25 = vld [vmem:[#allocation5 + $0x484] ss:$16 sps:$4 sm:$0xff]  }
  0xb3   :  { %3299 = vmatpush1.bf16.msra.mxu0 %v5081_v26  ;;  %3627 = vmatpush1.bf16.msra.mxu1 %v5084_v27  ;;  %v5178_v26 = vld [vmem:[#allocation5 + $0x48c] ss:$16 sps:$4 sm:$0xff]   ;;  %v5173_v27 = vld [vmem:[#allocation5 + $0x480] ss:$16 sps:$4 sm:$0xff]  }
  0xb4   :  { %3300 = vmatprep.subr.bf16.mxu0 %v5089_v28  ;;  %3628 = vmatprep.subr.bf16.mxu1 %v5092_v29  ;;  %v5176_v28 = vld [vmem:[#allocation5 + $0x488] ss:$16 sps:$4 sm:$0xff]   ;;  %v5181_v29 = vld [vmem:[#allocation5 + $0x4a4] ss:$16 sps:$4 sm:$0xff]  }
  0xb7   :  { %3301 = vmatpush1.bf16.msra.mxu0 %v5087_v32  ;;  %3629 = vmatpush1.bf16.msra.mxu1 %v5090_v33  ;;  %v5182_v32 = vld [vmem:[#allocation5 + $0x4a8] ss:$16 sps:$4 sm:$0xff]   ;;  %v5187_v33 = vld [vmem:[#allocation5 + $0x4c4] ss:$16 sps:$4 sm:$0xff]  }
  0xb8   :  { %3302 = vmatprep.subr.bf16.mxu0 %v5095_v34  ;;  %3630 = vmatprep.subr.bf16.mxu1 %v5098_v35  ;;  %v5190_v34 = vld [vmem:[#allocation5 + $0x4cc] ss:$16 sps:$4 sm:$0xff]   ;;  %v5185_v35 = vld [vmem:[#allocation5 + $0x4c0] ss:$16 sps:$4 sm:$0xff]  }
  0xbb   :  { %3303 = vmatpush1.bf16.msra.mxu0 %v5093_v36  ;;  %3631 = vmatpush1.bf16.msra.mxu1 %v5096_v37  ;;  %v5188_v36 = vld [vmem:[#allocation5 + $0x4c8] ss:$16 sps:$4 sm:$0xff]   ;;  %v5193_v37 = vld [vmem:[#allocation5 + $0x4e4] ss:$16 sps:$4 sm:$0xff]  }
  0xbc   :  { %3304 = vmatprep.subr.bf16.mxu0 %v5101_v38  ;;  %3632 = vmatprep.subr.bf16.mxu1 %v5104_v39  ;;  %v5196_v38 = vld [vmem:[#allocation5 + $0x4ec] ss:$16 sps:$4 sm:$0xff]   ;;  %v5191_v39 = vld [vmem:[#allocation5 + $0x4e0] ss:$16 sps:$4 sm:$0xff]  }
  0xbf   :  { %3305 = vmatpush1.bf16.msra.mxu0 %v5099_v40  ;;  %3633 = vmatpush1.bf16.msra.mxu1 %v5102_v41  ;;  %v5194_v40 = vld [vmem:[#allocation5 + $0x4e8] ss:$16 sps:$4 sm:$0xff]   ;;  %v5199_v41 = vld [vmem:[#allocation5 + $0x504] ss:$16 sps:$4 sm:$0xff]  }
  0xc0   :  { %3306 = vmatprep.subr.bf16.mxu0 %v5107_v42  ;;  %3634 = vmatprep.subr.bf16.mxu1 %v5110_v43  ;;  %v5202_v42 = vld [vmem:[#allocation5 + $0x50c] ss:$16 sps:$4 sm:$0xff]   ;;  %v5197_v43 = vld [vmem:[#allocation5 + $0x500] ss:$16 sps:$4 sm:$0xff]  }
  0xc3   :  { %3307 = vmatpush1.bf16.msra.mxu0 %v5105_v44  ;;  %3635 = vmatpush1.bf16.msra.mxu1 %v5108_v45  ;;  %v5200_v44 = vld [vmem:[#allocation5 + $0x508] ss:$16 sps:$4 sm:$0xff]   ;;  %v5205_v45 = vld [vmem:[#allocation5 + $0x524] ss:$16 sps:$4 sm:$0xff]  }
  0xc4   :  { %3308 = vmatprep.subr.bf16.mxu0 %v5113_v46  ;;  %3636 = vmatprep.subr.bf16.mxu1 %v5116_v47  ;;  %v5208_v46 = vld [vmem:[#allocation5 + $0x52c] ss:$16 sps:$4 sm:$0xff]   ;;  %v5203_v47 = vld [vmem:[#allocation5 + $0x520] ss:$16 sps:$4 sm:$0xff]  }
  0xc7   :  { %3309 = vmatpush1.bf16.msra.mxu0 %v5111_v48  ;;  %3637 = vmatpush1.bf16.msra.mxu1 %v5114_v49  ;;  %v5206_v48 = vld [vmem:[#allocation5 + $0x528] ss:$16 sps:$4 sm:$0xff]   ;;  %v5211_v49 = vld [vmem:[#allocation5 + $0x544] ss:$16 sps:$4 sm:$0xff]  }
  0xc8   :  { %3310 = vmatprep.subr.bf16.mxu0 %v5119_v50  ;;  %3638 = vmatprep.subr.bf16.mxu1 %v5122_v51  ;;  %v5214_v50 = vld [vmem:[#allocation5 + $0x54c] ss:$16 sps:$4 sm:$0xff]   ;;  %v5209_v51 = vld [vmem:[#allocation5 + $0x540] ss:$16 sps:$4 sm:$0xff]  }
  0xcb   :  { %3311 = vmatpush1.bf16.msra.mxu0 %v5117_v52  ;;  %3639 = vmatpush1.bf16.msra.mxu1 %v5120_v53  ;;  %v5212_v52 = vld [vmem:[#allocation5 + $0x548] ss:$16 sps:$4 sm:$0xff]   ;;  %v5217_v53 = vld [vmem:[#allocation5 + $0x564] ss:$16 sps:$4 sm:$0xff]  }
  0xcc   :  { %3312 = vmatprep.subr.bf16.mxu0 %v5125_v54  ;;  %3640 = vmatprep.subr.bf16.mxu1 %v5128_v55  ;;  %v5220_v54 = vld [vmem:[#allocation5 + $0x56c] ss:$16 sps:$4 sm:$0xff]   ;;  %v5215_v55 = vld [vmem:[#allocation5 + $0x560] ss:$16 sps:$4 sm:$0xff]  }
  0xcf   :  { %3313 = vmatpush1.bf16.msra.mxu0 %v5123_v56  ;;  %3641 = vmatpush1.bf16.msra.mxu1 %v5126_v57  ;;  %v5218_v56 = vld [vmem:[#allocation5 + $0x568] ss:$16 sps:$4 sm:$0xff]   ;;  %v5223_v57 = vld [vmem:[#allocation5 + $0x584] ss:$16 sps:$4 sm:$0xff]  }
  0xd0   :  { %3314 = vmatprep.subr.bf16.mxu0 %v5131_v58  ;;  %3642 = vmatprep.subr.bf16.mxu1 %v5134_v59  ;;  %v5226_v58 = vld [vmem:[#allocation5 + $0x58c] ss:$16 sps:$4 sm:$0xff]   ;;  %v5221_v59 = vld [vmem:[#allocation5 + $0x580] ss:$16 sps:$4 sm:$0xff]  }
  0xd3   :  { %3315 = vmatpush1.bf16.msra.mxu0 %v5129_v60  ;;  %3643 = vmatpush1.bf16.msra.mxu1 %v5132_v61  ;;  %v5224_v60 = vld [vmem:[#allocation5 + $0x588] ss:$16 sps:$4 sm:$0xff]   ;;  %v5229_v61 = vld [vmem:[#allocation5 + $0x5a4] ss:$16 sps:$4 sm:$0xff]  }
  0xd4   :  { %3316 = vmatprep.subr.bf16.mxu0 %v5137_v62  ;;  %3644 = vmatprep.subr.bf16.mxu1 %v5140_v63  ;;  %v5232_v62 = vld [vmem:[#allocation5 + $0x5ac] ss:$16 sps:$4 sm:$0xff]   ;;  %v5227_v63 = vld [vmem:[#allocation5 + $0x5a0] ss:$16 sps:$4 sm:$0xff]  }
  0xd7   :  { %3317 = vmatpush1.bf16.msra.mxu0 %v5135_v0  ;;  %3645 = vmatpush1.bf16.msra.mxu1 %v5138_v1  ;;  %v5230_v0 = vld [vmem:[#allocation5 + $0x5a8] ss:$16 sps:$4 sm:$0xff]   ;;  %v5235_v1 = vld [vmem:[#allocation5 + $0x5c4] ss:$16 sps:$4 sm:$0xff]  }
  0xd8   :  { %3318 = vmatprep.subr.bf16.mxu0 %v5143_v2  ;;  %3646 = vmatprep.subr.bf16.mxu1 %v5146_v3  ;;  %v5238_v2 = vld [vmem:[#allocation5 + $0x5cc] ss:$16 sps:$4 sm:$0xff]   ;;  %v5233_v3 = vld [vmem:[#allocation5 + $0x5c0] ss:$16 sps:$4 sm:$0xff]  }
  0xdb   :  { %3319 = vmatpush1.bf16.msra.mxu0 %v5141_v4  ;;  %3647 = vmatpush1.bf16.msra.mxu1 %v5144_v5  ;;  %v5236_v4 = vld [vmem:[#allocation5 + $0x5c8] ss:$16 sps:$4 sm:$0xff]   ;;  %v5241_v5 = vld [vmem:[#allocation5 + $0x5e4] ss:$16 sps:$4 sm:$0xff]  }
  0xdc   :  { %3329 = vmatprep.subr.bf16.mxu0 %v5151_v6  ;;  %3657 = vmatprep.subr.bf16.mxu1 %v5154_v7  ;;  %v5244_v6 = vld [vmem:[#allocation5 + $0x5ec] ss:$16 sps:$4 sm:$0xff]   ;;  %v5239_v7 = vld [vmem:[#allocation5 + $0x5e0] ss:$16 sps:$4 sm:$0xff]  }
  0xde   :  { %3321 = vmatmul.mubr.bf16.vlgmr.msra.gmra.mrb[0].mxu0 %v4281_v8  ;;  %3649 = vmatmul.mubr.bf16.vlgmr.msra.gmra.mrb[0].mxu1 %v4281_v8  ;;  %v5242_v8 = vld [vmem:[#allocation5 + $0x5e8] ss:$16 sps:$4 sm:$0xff]  }
  0xdf   :  { %3330 = vmatpush1.bf16.msra.mxu0 %v5149_v9  ;;  %3658 = vmatpush1.bf16.msra.mxu1 %v5152_v10  ;;  %v5249_v9 = vld [vmem:[#allocation5 + $0x604] ss:$16 sps:$4 sm:$0xff]   ;;  %v5252_v10 = vld [vmem:[#allocation5 + $0x60c] ss:$16 sps:$4 sm:$0xff]  }
  0xe0   :  { %3331 = vmatprep.subr.bf16.mxu0 %v5157_v11  ;;  %3659 = vmatprep.subr.bf16.mxu1 %v5160_v13  ;;  %v5247_v11 = vld [vmem:[#allocation5 + $0x600] ss:$16 sps:$4 sm:$0xff]   ;;  %v4283_v13 = vcombine.low %v6001_v12, %v6001_v12  ;;  %v5264_v12 = vld [vmem:[#allocation5 + $0x64c] ss:$16 sps:$4 sm:$0xff]  }
  0xe1   :  { %3361 = vmatprep.mubr.bf16.mxu0 %v4284_v14  ;;  %3689 = vmatprep.mubr.bf16.mxu1 %v4284_v14  ;;  %v5250_v14 = vld [vmem:[#allocation5 + $0x608] ss:$16 sps:$4 sm:$0xff]  }
  0xe3   :  { %3332 = vmatpush1.bf16.msra.mxu0 %v5155_v15  ;;  %3660 = vmatpush1.bf16.msra.mxu1 %v5158_v16  ;;  %v6007_v15 = vld [vmem:[#allocation3 + $0x18] sm:$0xff]  ;;  %v5255_v16 = vld [vmem:[#allocation5 + $0x624] ss:$16 sps:$4 sm:$0xff]  }
  0xe4   :  { %3333 = vmatprep.subr.bf16.mxu0 %v5163_v17  ;;  %3661 = vmatprep.subr.bf16.mxu1 %v5166_v18  ;;  %v5258_v17 = vld [vmem:[#allocation5 + $0x62c] ss:$16 sps:$4 sm:$0xff]   ;;  %v4286_v18 = vcombine.high %v6007_v15, %v6007_v15 }
  0xe7   :  { %3334 = vmatpush1.bf16.msra.mxu0 %v5161_v19  ;;  %3662 = vmatpush1.bf16.msra.mxu1 %v5164_v20  ;;  %v5253_v19 = vld [vmem:[#allocation5 + $0x620] ss:$16 sps:$4 sm:$0xff]   ;;  %v5256_v20 = vld [vmem:[#allocation5 + $0x628] ss:$16 sps:$4 sm:$0xff]  }
  0xe8   :  { %3335 = vmatprep.subr.bf16.mxu0 %v5169_v21  ;;  %3663 = vmatprep.subr.bf16.mxu1 %v5172_v22  ;;  %v5261_v21 = vld [vmem:[#allocation5 + $0x644] ss:$16 sps:$4 sm:$0xff]   ;;  %v5259_v22 = vld [vmem:[#allocation5 + $0x640] ss:$16 sps:$4 sm:$0xff]  }
  0xeb   :  { %3336 = vmatpush1.bf16.msra.mxu0 %v5167_v23  ;;  %3664 = vmatpush1.bf16.msra.mxu1 %v5170_v24  ;;  %v5262_v23 = vld [vmem:[#allocation5 + $0x648] ss:$16 sps:$4 sm:$0xff]   ;;  %v5267_v24 = vld [vmem:[#allocation5 + $0x664] ss:$16 sps:$4 sm:$0xff]  }
  0xec   :  { %3337 = vmatprep.subr.bf16.mxu0 %v5175_v25  ;;  %3665 = vmatprep.subr.bf16.mxu1 %v5178_v26  ;;  %v5270_v25 = vld [vmem:[#allocation5 + $0x66c] ss:$16 sps:$4 sm:$0xff]   ;;  %v5265_v26 = vld [vmem:[#allocation5 + $0x660] ss:$16 sps:$4 sm:$0xff]  }
  0xef   :  { %3338 = vmatpush1.bf16.msra.mxu0 %v5173_v27  ;;  %3666 = vmatpush1.bf16.msra.mxu1 %v5176_v28  ;;  %v5268_v27 = vld [vmem:[#allocation5 + $0x668] ss:$16 sps:$4 sm:$0xff]   ;;  %v5273_v28 = vld [vmem:[#allocation5 + $0x684] ss:$16 sps:$4 sm:$0xff]  }
  0xf0   :  { %3339 = vmatprep.subr.bf16.mxu0 %v5181_v29  ;;  %3667 = vmatprep.subr.bf16.mxu1 %v5184_v30  ;;  %v5276_v29 = vld [vmem:[#allocation5 + $0x68c] ss:$16 sps:$4 sm:$0xff]   ;;  %v5271_v30 = vld [vmem:[#allocation5 + $0x680] ss:$16 sps:$4 sm:$0xff]  }
  0xf3   :  { %3340 = vmatpush1.bf16.msra.mxu0 %v5179_v31  ;;  %3668 = vmatpush1.bf16.msra.mxu1 %v5182_v32  ;;  %v5274_v31 = vld [vmem:[#allocation5 + $0x688] ss:$16 sps:$4 sm:$0xff]   ;;  %v5279_v32 = vld [vmem:[#allocation5 + $0x6a4] ss:$16 sps:$4 sm:$0xff]  }
  0xf4   :  { %3341 = vmatprep.subr.bf16.mxu0 %v5187_v33  ;;  %3669 = vmatprep.subr.bf16.mxu1 %v5190_v34  ;;  %v5282_v33 = vld [vmem:[#allocation5 + $0x6ac] ss:$16 sps:$4 sm:$0xff]   ;;  %v5277_v34 = vld [vmem:[#allocation5 + $0x6a0] ss:$16 sps:$4 sm:$0xff]  }
  0xf7   :  { %3342 = vmatpush1.bf16.msra.mxu0 %v5185_v35  ;;  %3670 = vmatpush1.bf16.msra.mxu1 %v5188_v36  ;;  %v5280_v35 = vld [vmem:[#allocation5 + $0x6a8] ss:$16 sps:$4 sm:$0xff]   ;;  %v5285_v36 = vld [vmem:[#allocation5 + $0x6c4] ss:$16 sps:$4 sm:$0xff]  }
  0xf8   :  { %3343 = vmatprep.subr.bf16.mxu0 %v5193_v37  ;;  %3671 = vmatprep.subr.bf16.mxu1 %v5196_v38  ;;  %v5288_v37 = vld [vmem:[#allocation5 + $0x6cc] ss:$16 sps:$4 sm:$0xff]   ;;  %v5283_v38 = vld [vmem:[#allocation5 + $0x6c0] ss:$16 sps:$4 sm:$0xff]  }
  0xfb   :  { %3344 = vmatpush1.bf16.msra.mxu0 %v5191_v39  ;;  %3672 = vmatpush1.bf16.msra.mxu1 %v5194_v40  ;;  %v5286_v39 = vld [vmem:[#allocation5 + $0x6c8] ss:$16 sps:$4 sm:$0xff]   ;;  %v5291_v40 = vld [vmem:[#allocation5 + $0x6e4] ss:$16 sps:$4 sm:$0xff]  }
  0xfc   :  { %3345 = vmatprep.subr.bf16.mxu0 %v5199_v41  ;;  %3673 = vmatprep.subr.bf16.mxu1 %v5202_v42  ;;  %v5294_v41 = vld [vmem:[#allocation5 + $0x6ec] ss:$16 sps:$4 sm:$0xff]   ;;  %v5289_v42 = vld [vmem:[#allocation5 + $0x6e0] ss:$16 sps:$4 sm:$0xff]  }
  0xff   :  { %3346 = vmatpush1.bf16.msra.mxu0 %v5197_v43  ;;  %3674 = vmatpush1.bf16.msra.mxu1 %v5200_v44  ;;  %v5292_v43 = vld [vmem:[#allocation5 + $0x6e8] ss:$16 sps:$4 sm:$0xff]   ;;  %v5297_v44 = vld [vmem:[#allocation5 + $0x704] ss:$16 sps:$4 sm:$0xff]  }
 0x100   :  { %3347 = vmatprep.subr.bf16.mxu0 %v5205_v45  ;;  %3675 = vmatprep.subr.bf16.mxu1 %v5208_v46  ;;  %v5300_v45 = vld [vmem:[#allocation5 + $0x70c] ss:$16 sps:$4 sm:$0xff]   ;;  %v5295_v46 = vld [vmem:[#allocation5 + $0x700] ss:$16 sps:$4 sm:$0xff]  }
 0x103   :  { %3348 = vmatpush1.bf16.msra.mxu0 %v5203_v47  ;;  %3676 = vmatpush1.bf16.msra.mxu1 %v5206_v48  ;;  %v5298_v47 = vld [vmem:[#allocation5 + $0x708] ss:$16 sps:$4 sm:$0xff]   ;;  %v5303_v48 = vld [vmem:[#allocation5 + $0x724] ss:$16 sps:$4 sm:$0xff]  }
 0x104   :  { %3349 = vmatprep.subr.bf16.mxu0 %v5211_v49  ;;  %3677 = vmatprep.subr.bf16.mxu1 %v5214_v50  ;;  %v5306_v49 = vld [vmem:[#allocation5 + $0x72c] ss:$16 sps:$4 sm:$0xff]   ;;  %v5301_v50 = vld [vmem:[#allocation5 + $0x720] ss:$16 sps:$4 sm:$0xff]  }
 0x107   :  { %3350 = vmatpush1.bf16.msra.mxu0 %v5209_v51  ;;  %3678 = vmatpush1.bf16.msra.mxu1 %v5212_v52  ;;  %v5304_v51 = vld [vmem:[#allocation5 + $0x728] ss:$16 sps:$4 sm:$0xff]   ;;  %v5309_v52 = vld [vmem:[#allocation5 + $0x744] ss:$16 sps:$4 sm:$0xff]  }
 0x108   :  { %3351 = vmatprep.subr.bf16.mxu0 %v5217_v53  ;;  %3679 = vmatprep.subr.bf16.mxu1 %v5220_v54  ;;  %v5312_v53 = vld [vmem:[#allocation5 + $0x74c] ss:$16 sps:$4 sm:$0xff]   ;;  %v5307_v54 = vld [vmem:[#allocation5 + $0x740] ss:$16 sps:$4 sm:$0xff]  }
 0x10b   :  { %3352 = vmatpush1.bf16.msra.mxu0 %v5215_v55  ;;  %3680 = vmatpush1.bf16.msra.mxu1 %v5218_v56  ;;  %v5310_v55 = vld [vmem:[#allocation5 + $0x748] ss:$16 sps:$4 sm:$0xff]   ;;  %v5315_v56 = vld [vmem:[#allocation5 + $0x764] ss:$16 sps:$4 sm:$0xff]  }
 0x10c   :  { %3353 = vmatprep.subr.bf16.mxu0 %v5223_v57  ;;  %3681 = vmatprep.subr.bf16.mxu1 %v5226_v58  ;;  %v5318_v57 = vld [vmem:[#allocation5 + $0x76c] ss:$16 sps:$4 sm:$0xff]   ;;  %v5313_v58 = vld [vmem:[#allocation5 + $0x760] ss:$16 sps:$4 sm:$0xff]  }
 0x10f   :  { %3354 = vmatpush1.bf16.msra.mxu0 %v5221_v59  ;;  %3682 = vmatpush1.bf16.msra.mxu1 %v5224_v60  ;;  %v5316_v59 = vld [vmem:[#allocation5 + $0x768] ss:$16 sps:$4 sm:$0xff]   ;;  %v5321_v60 = vld [vmem:[#allocation5 + $0x784] ss:$16 sps:$4 sm:$0xff]  }
 0x110   :  { %3355 = vmatprep.subr.bf16.mxu0 %v5229_v61  ;;  %3683 = vmatprep.subr.bf16.mxu1 %v5232_v62  ;;  %v5324_v61 = vld [vmem:[#allocation5 + $0x78c] ss:$16 sps:$4 sm:$0xff]   ;;  %v5319_v62 = vld [vmem:[#allocation5 + $0x780] ss:$16 sps:$4 sm:$0xff]  }
 0x113   :  { %3356 = vmatpush1.bf16.msra.mxu0 %v5227_v63  ;;  %3684 = vmatpush1.bf16.msra.mxu1 %v5230_v0  ;;  %v5322_v63 = vld [vmem:[#allocation5 + $0x788] ss:$16 sps:$4 sm:$0xff]   ;;  %v5327_v0 = vld [vmem:[#allocation5 + $0x7a4] ss:$16 sps:$4 sm:$0xff]  }
 0x114   :  { %3357 = vmatprep.subr.bf16.mxu0 %v5235_v1  ;;  %3685 = vmatprep.subr.bf16.mxu1 %v5238_v2  ;;  %v5330_v1 = vld [vmem:[#allocation5 + $0x7ac] ss:$16 sps:$4 sm:$0xff]   ;;  %v5325_v2 = vld [vmem:[#allocation5 + $0x7a0] ss:$16 sps:$4 sm:$0xff]  }
 0x117   :  { %3358 = vmatpush1.bf16.msra.mxu0 %v5233_v3  ;;  %3686 = vmatpush1.bf16.msra.mxu1 %v5236_v4  ;;  %v5328_v3 = vld [vmem:[#allocation5 + $0x7a8] ss:$16 sps:$4 sm:$0xff]   ;;  %v5333_v4 = vld [vmem:[#allocation5 + $0x7c4] ss:$16 sps:$4 sm:$0xff]  }
 0x118   :  { %3359 = vmatprep.subr.bf16.mxu0 %v5241_v5  ;;  %3687 = vmatprep.subr.bf16.mxu1 %v5244_v6  ;;  %v5336_v5 = vld [vmem:[#allocation5 + $0x7cc] ss:$16 sps:$4 sm:$0xff]   ;;  %v5331_v6 = vld [vmem:[#allocation5 + $0x7c0] ss:$16 sps:$4 sm:$0xff]  }
 0x11b   :  { %3360 = vmatpush1.bf16.msra.mxu0 %v5239_v7  ;;  %3688 = vmatpush1.bf16.msra.mxu1 %v5242_v8  ;;  %v5334_v7 = vld [vmem:[#allocation5 + $0x7c8] ss:$16 sps:$4 sm:$0xff]   ;;  %v5339_v8 = vld [vmem:[#allocation5 + $0x7e4] ss:$16 sps:$4 sm:$0xff]  }
 0x11c   :  { %3370 = vmatprep.subr.bf16.mxu0 %v5249_v9  ;;  %3698 = vmatprep.subr.bf16.mxu1 %v5252_v10  ;;  %v5342_v9 = vld [vmem:[#allocation5 + $0x7ec] ss:$16 sps:$4 sm:$0xff]   ;;  %v5337_v10 = vld [vmem:[#allocation5 + $0x7e0] ss:$16 sps:$4 sm:$0xff]  }
 0x11e   :  { %3362 = vmatmul.mubr.bf16.vlgmr.msra.gmra.mrb[0].mxu0 %v4283_v13  ;;  %3690 = vmatmul.mubr.bf16.vlgmr.msra.gmra.mrb[0].mxu1 %v4283_v13  ;;  %v5347_v13 = vld [vmem:[#allocation5 + $0x804] ss:$16 sps:$4 sm:$0xff]  }
 0x11f   :  { %3371 = vmatpush1.bf16.msra.mxu0 %v5247_v11  ;;  %3699 = vmatpush1.bf16.msra.mxu1 %v5250_v14  ;;  %v5340_v11 = vld [vmem:[#allocation5 + $0x7e8] ss:$16 sps:$4 sm:$0xff]   ;;  %v5350_v14 = vld [vmem:[#allocation5 + $0x80c] ss:$16 sps:$4 sm:$0xff]  }
 0x120   :  { %3372 = vmatprep.subr.bf16.mxu0 %v5255_v16  ;;  %3700 = vmatprep.subr.bf16.mxu1 %v5258_v17  ;;  %v5345_v16 = vld [vmem:[#allocation5 + $0x800] ss:$16 sps:$4 sm:$0xff]   ;;  %v4285_v17 = vcombine.low %v6007_v15, %v6007_v15  ;;  %v5359_v15 = vld [vmem:[#allocation5 + $0x844] ss:$16 sps:$4 sm:$0xff]  }
 0x121   :  { %3402 = vmatprep.mubr.bf16.mxu0 %v4286_v18  ;;  %3730 = vmatprep.mubr.bf16.mxu1 %v4286_v18  ;;  %v6013_v18 = vld [vmem:[#allocation3 + $0x20] sm:$0xff] }
 0x123   :  { %3373 = vmatpush1.bf16.msra.mxu0 %v5253_v19  ;;  %3701 = vmatpush1.bf16.msra.mxu1 %v5256_v20  ;;  %v5348_v19 = vld [vmem:[#allocation5 + $0x808] ss:$16 sps:$4 sm:$0xff]   ;;  %v5353_v20 = vld [vmem:[#allocation5 + $0x824] ss:$16 sps:$4 sm:$0xff]  }
 0x124   :  { %3374 = vmatprep.subr.bf16.mxu0 %v5261_v21  ;;  %3702 = vmatprep.subr.bf16.mxu1 %v5264_v12  ;;  %v5356_v21 = vld [vmem:[#allocation5 + $0x82c] ss:$16 sps:$4 sm:$0xff]   ;;  %v4288_v12 = vcombine.high %v6013_v18, %v6013_v18 }
 0x127   :  { %3375 = vmatpush1.bf16.msra.mxu0 %v5259_v22  ;;  %3703 = vmatpush1.bf16.msra.mxu1 %v5262_v23  ;;  %v5351_v22 = vld [vmem:[#allocation5 + $0x820] ss:$16 sps:$4 sm:$0xff]   ;;  %v5354_v23 = vld [vmem:[#allocation5 + $0x828] ss:$16 sps:$4 sm:$0xff]  }
 0x128   :  { %3376 = vmatprep.subr.bf16.mxu0 %v5267_v24  ;;  %3704 = vmatprep.subr.bf16.mxu1 %v5270_v25  ;;  %v5362_v24 = vld [vmem:[#allocation5 + $0x84c] ss:$16 sps:$4 sm:$0xff]   ;;  %v5357_v25 = vld [vmem:[#allocation5 + $0x840] ss:$16 sps:$4 sm:$0xff]  }
 0x12b   :  { %3377 = vmatpush1.bf16.msra.mxu0 %v5265_v26  ;;  %3705 = vmatpush1.bf16.msra.mxu1 %v5268_v27  ;;  %v5360_v26 = vld [vmem:[#allocation5 + $0x848] ss:$16 sps:$4 sm:$0xff]   ;;  %v5365_v27 = vld [vmem:[#allocation5 + $0x864] ss:$16 sps:$4 sm:$0xff]  }
 0x12c   :  { %3378 = vmatprep.subr.bf16.mxu0 %v5273_v28  ;;  %3706 = vmatprep.subr.bf16.mxu1 %v5276_v29  ;;  %v5368_v28 = vld [vmem:[#allocation5 + $0x86c] ss:$16 sps:$4 sm:$0xff]   ;;  %v5363_v29 = vld [vmem:[#allocation5 + $0x860] ss:$16 sps:$4 sm:$0xff]  }
 0x12f   :  { %3379 = vmatpush1.bf16.msra.mxu0 %v5271_v30  ;;  %3707 = vmatpush1.bf16.msra.mxu1 %v5274_v31  ;;  %v5366_v30 = vld [vmem:[#allocation5 + $0x868] ss:$16 sps:$4 sm:$0xff]   ;;  %v5371_v31 = vld [vmem:[#allocation5 + $0x884] ss:$16 sps:$4 sm:$0xff]  }
 0x130   :  { %3380 = vmatprep.subr.bf16.mxu0 %v5279_v32  ;;  %3708 = vmatprep.subr.bf16.mxu1 %v5282_v33  ;;  %v5374_v32 = vld [vmem:[#allocation5 + $0x88c] ss:$16 sps:$4 sm:$0xff]   ;;  %v5369_v33 = vld [vmem:[#allocation5 + $0x880] ss:$16 sps:$4 sm:$0xff]  }
 0x133   :  { %3381 = vmatpush1.bf16.msra.mxu0 %v5277_v34  ;;  %3709 = vmatpush1.bf16.msra.mxu1 %v5280_v35  ;;  %v5372_v34 = vld [vmem:[#allocation5 + $0x888] ss:$16 sps:$4 sm:$0xff]   ;;  %v5377_v35 = vld [vmem:[#allocation5 + $0x8a4] ss:$16 sps:$4 sm:$0xff]  }
 0x134   :  { %3382 = vmatprep.subr.bf16.mxu0 %v5285_v36  ;;  %3710 = vmatprep.subr.bf16.mxu1 %v5288_v37  ;;  %v5380_v36 = vld [vmem:[#allocation5 + $0x8ac] ss:$16 sps:$4 sm:$0xff]   ;;  %v5375_v37 = vld [vmem:[#allocation5 + $0x8a0] ss:$16 sps:$4 sm:$0xff]  }
 0x137   :  { %3383 = vmatpush1.bf16.msra.mxu0 %v5283_v38  ;;  %3711 = vmatpush1.bf16.msra.mxu1 %v5286_v39  ;;  %v5378_v38 = vld [vmem:[#allocation5 + $0x8a8] ss:$16 sps:$4 sm:$0xff]   ;;  %v5383_v39 = vld [vmem:[#allocation5 + $0x8c4] ss:$16 sps:$4 sm:$0xff]  }
 0x138   :  { %3384 = vmatprep.subr.bf16.mxu0 %v5291_v40  ;;  %3712 = vmatprep.subr.bf16.mxu1 %v5294_v41  ;;  %v5386_v40 = vld [vmem:[#allocation5 + $0x8cc] ss:$16 sps:$4 sm:$0xff]   ;;  %v5381_v41 = vld [vmem:[#allocation5 + $0x8c0] ss:$16 sps:$4 sm:$0xff]  }
 0x13b   :  { %3385 = vmatpush1.bf16.msra.mxu0 %v5289_v42  ;;  %3713 = vmatpush1.bf16.msra.mxu1 %v5292_v43  ;;  %v5384_v42 = vld [vmem:[#allocation5 + $0x8c8] ss:$16 sps:$4 sm:$0xff]   ;;  %v5389_v43 = vld [vmem:[#allocation5 + $0x8e4] ss:$16 sps:$4 sm:$0xff]  }
 0x13c   :  { %3386 = vmatprep.subr.bf16.mxu0 %v5297_v44  ;;  %3714 = vmatprep.subr.bf16.mxu1 %v5300_v45  ;;  %v5392_v44 = vld [vmem:[#allocation5 + $0x8ec] ss:$16 sps:$4 sm:$0xff]   ;;  %v5387_v45 = vld [vmem:[#allocation5 + $0x8e0] ss:$16 sps:$4 sm:$0xff]  }
 0x13f   :  { %3387 = vmatpush1.bf16.msra.mxu0 %v5295_v46  ;;  %3715 = vmatpush1.bf16.msra.mxu1 %v5298_v47  ;;  %v5390_v46 = vld [vmem:[#allocation5 + $0x8e8] ss:$16 sps:$4 sm:$0xff]   ;;  %v5395_v47 = vld [vmem:[#allocation5 + $0x904] ss:$16 sps:$4 sm:$0xff]  }
 0x140   :  { %3388 = vmatprep.subr.bf16.mxu0 %v5303_v48  ;;  %3716 = vmatprep.subr.bf16.mxu1 %v5306_v49  ;;  %v5398_v48 = vld [vmem:[#allocation5 + $0x90c] ss:$16 sps:$4 sm:$0xff]   ;;  %v5393_v49 = vld [vmem:[#allocation5 + $0x900] ss:$16 sps:$4 sm:$0xff]  }
 0x143   :  { %3389 = vmatpush1.bf16.msra.mxu0 %v5301_v50  ;;  %3717 = vmatpush1.bf16.msra.mxu1 %v5304_v51  ;;  %v5396_v50 = vld [vmem:[#allocation5 + $0x908] ss:$16 sps:$4 sm:$0xff]   ;;  %v5401_v51 = vld [vmem:[#allocation5 + $0x924] ss:$16 sps:$4 sm:$0xff]  }
 0x144   :  { %3390 = vmatprep.subr.bf16.mxu0 %v5309_v52  ;;  %3718 = vmatprep.subr.bf16.mxu1 %v5312_v53  ;;  %v5404_v52 = vld [vmem:[#allocation5 + $0x92c] ss:$16 sps:$4 sm:$0xff]   ;;  %v5399_v53 = vld [vmem:[#allocation5 + $0x920] ss:$16 sps:$4 sm:$0xff]  }
 0x147   :  { %3391 = vmatpush1.bf16.msra.mxu0 %v5307_v54  ;;  %3719 = vmatpush1.bf16.msra.mxu1 %v5310_v55  ;;  %v5402_v54 = vld [vmem:[#allocation5 + $0x928] ss:$16 sps:$4 sm:$0xff]   ;;  %v5407_v55 = vld [vmem:[#allocation5 + $0x944] ss:$16 sps:$4 sm:$0xff]  }
 0x148   :  { %3392 = vmatprep.subr.bf16.mxu0 %v5315_v56  ;;  %3720 = vmatprep.subr.bf16.mxu1 %v5318_v57  ;;  %v5410_v56 = vld [vmem:[#allocation5 + $0x94c] ss:$16 sps:$4 sm:$0xff]   ;;  %v5405_v57 = vld [vmem:[#allocation5 + $0x940] ss:$16 sps:$4 sm:$0xff]  }
 0x14b   :  { %3393 = vmatpush1.bf16.msra.mxu0 %v5313_v58  ;;  %3721 = vmatpush1.bf16.msra.mxu1 %v5316_v59  ;;  %v5408_v58 = vld [vmem:[#allocation5 + $0x948] ss:$16 sps:$4 sm:$0xff]   ;;  %v5413_v59 = vld [vmem:[#allocation5 + $0x964] ss:$16 sps:$4 sm:$0xff]  }
 0x14c   :  { %3394 = vmatprep.subr.bf16.mxu0 %v5321_v60  ;;  %3722 = vmatprep.subr.bf16.mxu1 %v5324_v61  ;;  %v5416_v60 = vld [vmem:[#allocation5 + $0x96c] ss:$16 sps:$4 sm:$0xff]   ;;  %v5411_v61 = vld [vmem:[#allocation5 + $0x960] ss:$16 sps:$4 sm:$0xff]  }
 0x14f   :  { %3395 = vmatpush1.bf16.msra.mxu0 %v5319_v62  ;;  %3723 = vmatpush1.bf16.msra.mxu1 %v5322_v63  ;;  %v5414_v62 = vld [vmem:[#allocation5 + $0x968] ss:$16 sps:$4 sm:$0xff]   ;;  %v5419_v63 = vld [vmem:[#allocation5 + $0x984] ss:$16 sps:$4 sm:$0xff]  }
 0x150   :  { %3396 = vmatprep.subr.bf16.mxu0 %v5327_v0  ;;  %3724 = vmatprep.subr.bf16.mxu1 %v5330_v1  ;;  %v5422_v0 = vld [vmem:[#allocation5 + $0x98c] ss:$16 sps:$4 sm:$0xff]   ;;  %v5417_v1 = vld [vmem:[#allocation5 + $0x980] ss:$16 sps:$4 sm:$0xff]  }
 0x153   :  { %3397 = vmatpush1.bf16.msra.mxu0 %v5325_v2  ;;  %3725 = vmatpush1.bf16.msra.mxu1 %v5328_v3  ;;  %v5420_v2 = vld [vmem:[#allocation5 + $0x988] ss:$16 sps:$4 sm:$0xff]   ;;  %v5425_v3 = vld [vmem:[#allocation5 + $0x9a4] ss:$16 sps:$4 sm:$0xff]  }
 0x154   :  { %3398 = vmatprep.subr.bf16.mxu0 %v5333_v4  ;;  %3726 = vmatprep.subr.bf16.mxu1 %v5336_v5  ;;  %v5428_v4 = vld [vmem:[#allocation5 + $0x9ac] ss:$16 sps:$4 sm:$0xff]   ;;  %v5423_v5 = vld [vmem:[#allocation5 + $0x9a0] ss:$16 sps:$4 sm:$0xff]  }
 0x157   :  { %3399 = vmatpush1.bf16.msra.mxu0 %v5331_v6  ;;  %3727 = vmatpush1.bf16.msra.mxu1 %v5334_v7  ;;  %v5426_v6 = vld [vmem:[#allocation5 + $0x9a8] ss:$16 sps:$4 sm:$0xff]   ;;  %v5431_v7 = vld [vmem:[#allocation5 + $0x9c4] ss:$16 sps:$4 sm:$0xff]  }
 0x158   :  { %3400 = vmatprep.subr.bf16.mxu0 %v5339_v8  ;;  %3728 = vmatprep.subr.bf16.mxu1 %v5342_v9  ;;  %v5434_v8 = vld [vmem:[#allocation5 + $0x9cc] ss:$16 sps:$4 sm:$0xff]   ;;  %v5429_v9 = vld [vmem:[#allocation5 + $0x9c0] ss:$16 sps:$4 sm:$0xff]  }
 0x15b   :  { %3401 = vmatpush1.bf16.msra.mxu0 %v5337_v10  ;;  %3729 = vmatpush1.bf16.msra.mxu1 %v5340_v11  ;;  %v5432_v10 = vld [vmem:[#allocation5 + $0x9c8] ss:$16 sps:$4 sm:$0xff]   ;;  %v5437_v11 = vld [vmem:[#allocation5 + $0x9e4] ss:$16 sps:$4 sm:$0xff]  }
 0x15c   :  { %3411 = vmatprep.subr.bf16.mxu0 %v5347_v13  ;;  %3739 = vmatprep.subr.bf16.mxu1 %v5350_v14  ;;  %v5440_v13 = vld [vmem:[#allocation5 + $0x9ec] ss:$16 sps:$4 sm:$0xff]   ;;  %v5435_v14 = vld [vmem:[#allocation5 + $0x9e0] ss:$16 sps:$4 sm:$0xff]  }
 0x15e   :  { %3403 = vmatmul.mubr.bf16.vlgmr.msra.gmra.mrb[0].mxu0 %v4285_v17  ;;  %3731 = vmatmul.mubr.bf16.vlgmr.msra.gmra.mrb[0].mxu1 %v4285_v17  ;;  %v5445_v17 = vld [vmem:[#allocation5 + $0xa04] ss:$16 sps:$4 sm:$0xff]  }
 0x15f   :  { %3412 = vmatpush1.bf16.msra.mxu0 %v5345_v16  ;;  %3740 = vmatpush1.bf16.msra.mxu1 %v5348_v19  ;;  %v5438_v16 = vld [vmem:[#allocation5 + $0x9e8] ss:$16 sps:$4 sm:$0xff]   ;;  %v5448_v19 = vld [vmem:[#allocation5 + $0xa0c] ss:$16 sps:$4 sm:$0xff]  }
 0x160   :  { %3413 = vmatprep.subr.bf16.mxu0 %v5353_v20  ;;  %3741 = vmatprep.subr.bf16.mxu1 %v5356_v21  ;;  %v6017_v20 = vld [vmem:[#allocation3 + $0x28] sm:$0xff]  ;;  %v4287_v21 = vcombine.low %v6013_v18, %v6013_v18  ;;  %v5457_v18 = vld [vmem:[#allocation5 + $0xa44] ss:$16 sps:$4 sm:$0xff]  }
 0x161   :  { %3443 = vmatprep.mubr.bf16.mxu0 %v4288_v12  ;;  %3771 = vmatprep.mubr.bf16.mxu1 %v4288_v12  ;;  %v5443_v12 = vld [vmem:[#allocation5 + $0xa00] ss:$16 sps:$4 sm:$0xff]  }
 0x163   :  { %3414 = vmatpush1.bf16.msra.mxu0 %v5351_v22  ;;  %3742 = vmatpush1.bf16.msra.mxu1 %v5354_v23  ;;  %v5446_v22 = vld [vmem:[#allocation5 + $0xa08] ss:$16 sps:$4 sm:$0xff]   ;;  %v5451_v23 = vld [vmem:[#allocation5 + $0xa24] ss:$16 sps:$4 sm:$0xff]  }
 0x164   :  { %3415 = vmatprep.subr.bf16.mxu0 %v5359_v15  ;;  %3743 = vmatprep.subr.bf16.mxu1 %v5362_v24  ;;  %v5454_v15 = vld [vmem:[#allocation5 + $0xa2c] ss:$16 sps:$4 sm:$0xff]   ;;  %v4290_v24 = vcombine.high %v6017_v20, %v6017_v20 }
 0x167   :  { %3416 = vmatpush1.bf16.msra.mxu0 %v5357_v25  ;;  %3744 = vmatpush1.bf16.msra.mxu1 %v5360_v26  ;;  %v5449_v25 = vld [vmem:[#allocation5 + $0xa20] ss:$16 sps:$4 sm:$0xff]   ;;  %v5452_v26 = vld [vmem:[#allocation5 + $0xa28] ss:$16 sps:$4 sm:$0xff]  }
 0x168   :  { %3417 = vmatprep.subr.bf16.mxu0 %v5365_v27  ;;  %3745 = vmatprep.subr.bf16.mxu1 %v5368_v28  ;;  %v5460_v27 = vld [vmem:[#allocation5 + $0xa4c] ss:$16 sps:$4 sm:$0xff]   ;;  %v5455_v28 = vld [vmem:[#allocation5 + $0xa40] ss:$16 sps:$4 sm:$0xff]  }
 0x16b   :  { %3418 = vmatpush1.bf16.msra.mxu0 %v5363_v29  ;;  %3746 = vmatpush1.bf16.msra.mxu1 %v5366_v30  ;;  %v5458_v29 = vld [vmem:[#allocation5 + $0xa48] ss:$16 sps:$4 sm:$0xff]   ;;  %v5463_v30 = vld [vmem:[#allocation5 + $0xa64] ss:$16 sps:$4 sm:$0xff]  }
 0x16c   :  { %3419 = vmatprep.subr.bf16.mxu0 %v5371_v31  ;;  %3747 = vmatprep.subr.bf16.mxu1 %v5374_v32  ;;  %v5466_v31 = vld [vmem:[#allocation5 + $0xa6c] ss:$16 sps:$4 sm:$0xff]   ;;  %v5461_v32 = vld [vmem:[#allocation5 + $0xa60] ss:$16 sps:$4 sm:$0xff]  }
 0x16f   :  { %3420 = vmatpush1.bf16.msra.mxu0 %v5369_v33  ;;  %3748 = vmatpush1.bf16.msra.mxu1 %v5372_v34  ;;  %v5464_v33 = vld [vmem:[#allocation5 + $0xa68] ss:$16 sps:$4 sm:$0xff]   ;;  %v5469_v34 = vld [vmem:[#allocation5 + $0xa84] ss:$16 sps:$4 sm:$0xff]  }
 0x170   :  { %3421 = vmatprep.subr.bf16.mxu0 %v5377_v35  ;;  %3749 = vmatprep.subr.bf16.mxu1 %v5380_v36  ;;  %v5472_v35 = vld [vmem:[#allocation5 + $0xa8c] ss:$16 sps:$4 sm:$0xff]   ;;  %v5467_v36 = vld [vmem:[#allocation5 + $0xa80] ss:$16 sps:$4 sm:$0xff]  }
 0x173   :  { %3422 = vmatpush1.bf16.msra.mxu0 %v5375_v37  ;;  %3750 = vmatpush1.bf16.msra.mxu1 %v5378_v38  ;;  %v5470_v37 = vld [vmem:[#allocation5 + $0xa88] ss:$16 sps:$4 sm:$0xff]   ;;  %v5475_v38 = vld [vmem:[#allocation5 + $0xaa4] ss:$16 sps:$4 sm:$0xff]  }
 0x174   :  { %3423 = vmatprep.subr.bf16.mxu0 %v5383_v39  ;;  %3751 = vmatprep.subr.bf16.mxu1 %v5386_v40  ;;  %v5478_v39 = vld [vmem:[#allocation5 + $0xaac] ss:$16 sps:$4 sm:$0xff]   ;;  %v5473_v40 = vld [vmem:[#allocation5 + $0xaa0] ss:$16 sps:$4 sm:$0xff]  }
 0x177   :  { %3424 = vmatpush1.bf16.msra.mxu0 %v5381_v41  ;;  %3752 = vmatpush1.bf16.msra.mxu1 %v5384_v42  ;;  %v5476_v41 = vld [vmem:[#allocation5 + $0xaa8] ss:$16 sps:$4 sm:$0xff]   ;;  %v5481_v42 = vld [vmem:[#allocation5 + $0xac4] ss:$16 sps:$4 sm:$0xff]  }
 0x178   :  { %3425 = vmatprep.subr.bf16.mxu0 %v5389_v43  ;;  %3753 = vmatprep.subr.bf16.mxu1 %v5392_v44  ;;  %v5484_v43 = vld [vmem:[#allocation5 + $0xacc] ss:$16 sps:$4 sm:$0xff]   ;;  %v5479_v44 = vld [vmem:[#allocation5 + $0xac0] ss:$16 sps:$4 sm:$0xff]  }
 0x17b   :  { %3426 = vmatpush1.bf16.msra.mxu0 %v5387_v45  ;;  %3754 = vmatpush1.bf16.msra.mxu1 %v5390_v46  ;;  %v5482_v45 = vld [vmem:[#allocation5 + $0xac8] ss:$16 sps:$4 sm:$0xff]   ;;  %v5487_v46 = vld [vmem:[#allocation5 + $0xae4] ss:$16 sps:$4 sm:$0xff]  }
 0x17c   :  { %3427 = vmatprep.subr.bf16.mxu0 %v5395_v47  ;;  %3755 = vmatprep.subr.bf16.mxu1 %v5398_v48  ;;  %v5490_v47 = vld [vmem:[#allocation5 + $0xaec] ss:$16 sps:$4 sm:$0xff]   ;;  %v5485_v48 = vld [vmem:[#allocation5 + $0xae0] ss:$16 sps:$4 sm:$0xff]  }
 0x17f   :  { %3428 = vmatpush1.bf16.msra.mxu0 %v5393_v49  ;;  %3756 = vmatpush1.bf16.msra.mxu1 %v5396_v50  ;;  %v5488_v49 = vld [vmem:[#allocation5 + $0xae8] ss:$16 sps:$4 sm:$0xff]   ;;  %v5493_v50 = vld [vmem:[#allocation5 + $0xb04] ss:$16 sps:$4 sm:$0xff]  }
 0x180   :  { %3429 = vmatprep.subr.bf16.mxu0 %v5401_v51  ;;  %3757 = vmatprep.subr.bf16.mxu1 %v5404_v52  ;;  %v5496_v51 = vld [vmem:[#allocation5 + $0xb0c] ss:$16 sps:$4 sm:$0xff]   ;;  %v5491_v52 = vld [vmem:[#allocation5 + $0xb00] ss:$16 sps:$4 sm:$0xff]  }
 0x183   :  { %3430 = vmatpush1.bf16.msra.mxu0 %v5399_v53  ;;  %3758 = vmatpush1.bf16.msra.mxu1 %v5402_v54  ;;  %v5494_v53 = vld [vmem:[#allocation5 + $0xb08] ss:$16 sps:$4 sm:$0xff]   ;;  %v5499_v54 = vld [vmem:[#allocation5 + $0xb24] ss:$16 sps:$4 sm:$0xff]  }
 0x184   :  { %3431 = vmatprep.subr.bf16.mxu0 %v5407_v55  ;;  %3759 = vmatprep.subr.bf16.mxu1 %v5410_v56  ;;  %v5502_v55 = vld [vmem:[#allocation5 + $0xb2c] ss:$16 sps:$4 sm:$0xff]   ;;  %v5497_v56 = vld [vmem:[#allocation5 + $0xb20] ss:$16 sps:$4 sm:$0xff]  }
 0x187   :  { %3432 = vmatpush1.bf16.msra.mxu0 %v5405_v57  ;;  %3760 = vmatpush1.bf16.msra.mxu1 %v5408_v58  ;;  %v5500_v57 = vld [vmem:[#allocation5 + $0xb28] ss:$16 sps:$4 sm:$0xff]   ;;  %v5505_v58 = vld [vmem:[#allocation5 + $0xb44] ss:$16 sps:$4 sm:$0xff]  }
 0x188   :  { %3433 = vmatprep.subr.bf16.mxu0 %v5413_v59  ;;  %3761 = vmatprep.subr.bf16.mxu1 %v5416_v60  ;;  %v5508_v59 = vld [vmem:[#allocation5 + $0xb4c] ss:$16 sps:$4 sm:$0xff]   ;;  %v5503_v60 = vld [vmem:[#allocation5 + $0xb40] ss:$16 sps:$4 sm:$0xff]  }
 0x18b   :  { %3434 = vmatpush1.bf16.msra.mxu0 %v5411_v61  ;;  %3762 = vmatpush1.bf16.msra.mxu1 %v5414_v62  ;;  %v5506_v61 = vld [vmem:[#allocation5 + $0xb48] ss:$16 sps:$4 sm:$0xff]   ;;  %v5511_v62 = vld [vmem:[#allocation5 + $0xb64] ss:$16 sps:$4 sm:$0xff]  }
 0x18c   :  { %3435 = vmatprep.subr.bf16.mxu0 %v5419_v63  ;;  %3763 = vmatprep.subr.bf16.mxu1 %v5422_v0  ;;  %v5514_v63 = vld [vmem:[#allocation5 + $0xb6c] ss:$16 sps:$4 sm:$0xff]   ;;  %v5509_v0 = vld [vmem:[#allocation5 + $0xb60] ss:$16 sps:$4 sm:$0xff]  }
 0x18f   :  { %3436 = vmatpush1.bf16.msra.mxu0 %v5417_v1  ;;  %3764 = vmatpush1.bf16.msra.mxu1 %v5420_v2  ;;  %v5512_v1 = vld [vmem:[#allocation5 + $0xb68] ss:$16 sps:$4 sm:$0xff]   ;;  %v5517_v2 = vld [vmem:[#allocation5 + $0xb84] ss:$16 sps:$4 sm:$0xff]  }
 0x190   :  { %3437 = vmatprep.subr.bf16.mxu0 %v5425_v3  ;;  %3765 = vmatprep.subr.bf16.mxu1 %v5428_v4  ;;  %v5520_v3 = vld [vmem:[#allocation5 + $0xb8c] ss:$16 sps:$4 sm:$0xff]   ;;  %v5515_v4 = vld [vmem:[#allocation5 + $0xb80] ss:$16 sps:$4 sm:$0xff]  }
 0x193   :  { %3438 = vmatpush1.bf16.msra.mxu0 %v5423_v5  ;;  %3766 = vmatpush1.bf16.msra.mxu1 %v5426_v6  ;;  %v5518_v5 = vld [vmem:[#allocation5 + $0xb88] ss:$16 sps:$4 sm:$0xff]   ;;  %v5523_v6 = vld [vmem:[#allocation5 + $0xba4] ss:$16 sps:$4 sm:$0xff]  }
 0x194   :  { %3439 = vmatprep.subr.bf16.mxu0 %v5431_v7  ;;  %3767 = vmatprep.subr.bf16.mxu1 %v5434_v8  ;;  %v5526_v7 = vld [vmem:[#allocation5 + $0xbac] ss:$16 sps:$4 sm:$0xff]   ;;  %v5521_v8 = vld [vmem:[#allocation5 + $0xba0] ss:$16 sps:$4 sm:$0xff]  }
 0x197   :  { %3440 = vmatpush1.bf16.msra.mxu0 %v5429_v9  ;;  %3768 = vmatpush1.bf16.msra.mxu1 %v5432_v10  ;;  %v5524_v9 = vld [vmem:[#allocation5 + $0xba8] ss:$16 sps:$4 sm:$0xff]   ;;  %v5529_v10 = vld [vmem:[#allocation5 + $0xbc4] ss:$16 sps:$4 sm:$0xff]  }
 0x198   :  { %3441 = vmatprep.subr.bf16.mxu0 %v5437_v11  ;;  %3769 = vmatprep.subr.bf16.mxu1 %v5440_v13  ;;  %v5532_v11 = vld [vmem:[#allocation5 + $0xbcc] ss:$16 sps:$4 sm:$0xff]   ;;  %v5527_v13 = vld [vmem:[#allocation5 + $0xbc0] ss:$16 sps:$4 sm:$0xff]  }
 0x19b   :  { %3442 = vmatpush1.bf16.msra.mxu0 %v5435_v14  ;;  %3770 = vmatpush1.bf16.msra.mxu1 %v5438_v16  ;;  %v5530_v14 = vld [vmem:[#allocation5 + $0xbc8] ss:$16 sps:$4 sm:$0xff]   ;;  %v5535_v16 = vld [vmem:[#allocation5 + $0xbe4] ss:$16 sps:$4 sm:$0xff]  }
 0x19c   :  { %3452 = vmatprep.subr.bf16.mxu0 %v5445_v17  ;;  %3780 = vmatprep.subr.bf16.mxu1 %v5448_v19  ;;  %v5538_v17 = vld [vmem:[#allocation5 + $0xbec] ss:$16 sps:$4 sm:$0xff]   ;;  %v5533_v19 = vld [vmem:[#allocation5 + $0xbe0] ss:$16 sps:$4 sm:$0xff]  }
 0x19e   :  { %3444 = vmatmul.mubr.bf16.vlgmr.msra.gmra.mrb[0].mxu0 %v4287_v21  ;;  %3772 = vmatmul.mubr.bf16.vlgmr.msra.gmra.mrb[0].mxu1 %v4287_v21  ;;  %v5536_v21 = vld [vmem:[#allocation5 + $0xbe8] ss:$16 sps:$4 sm:$0xff]  }
 0x19f   :  { %3453 = vmatpush1.bf16.msra.mxu0 %v5443_v12  ;;  %3781 = vmatpush1.bf16.msra.mxu1 %v5446_v22  ;;  %v5543_v12 = vld [vmem:[#allocation5 + $0xc04] ss:$16 sps:$4 sm:$0xff]   ;;  %v5546_v22 = vld [vmem:[#allocation5 + $0xc0c] ss:$16 sps:$4 sm:$0xff]  }
 0x1a0   :  { %3454 = vmatprep.subr.bf16.mxu0 %v5451_v23  ;;  %3782 = vmatprep.subr.bf16.mxu1 %v5454_v15  ;;  %v4289_v23 = vcombine.low %v6017_v20, %v6017_v20  ;;  %v6025_v15 = vld [vmem:[#allocation3 + $0x30] sm:$0xff] }
 0x1a1   :  { %3484 = vmatprep.mubr.bf16.mxu0 %v4290_v24  ;;  %3812 = vmatprep.mubr.bf16.mxu1 %v4290_v24  ;;  %v5541_v24 = vld [vmem:[#allocation5 + $0xc00] ss:$16 sps:$4 sm:$0xff]   ;;  %v5555_v20 = vld [vmem:[#allocation5 + $0xc44] ss:$16 sps:$4 sm:$0xff]  }
 0x1a3   :  { %3455 = vmatpush1.bf16.msra.mxu0 %v5449_v25  ;;  %3783 = vmatpush1.bf16.msra.mxu1 %v5452_v26  ;;  %v5544_v25 = vld [vmem:[#allocation5 + $0xc08] ss:$16 sps:$4 sm:$0xff]   ;;  %v5549_v26 = vld [vmem:[#allocation5 + $0xc24] ss:$16 sps:$4 sm:$0xff]  }
 0x1a4   :  { %3456 = vmatprep.subr.bf16.mxu0 %v5457_v18  ;;  %3784 = vmatprep.subr.bf16.mxu1 %v5460_v27  ;;  %v5552_v18 = vld [vmem:[#allocation5 + $0xc2c] ss:$16 sps:$4 sm:$0xff]   ;;  %v4292_v27 = vcombine.high %v6025_v15, %v6025_v15 }
 0x1a7   :  { %3457 = vmatpush1.bf16.msra.mxu0 %v5455_v28  ;;  %3785 = vmatpush1.bf16.msra.mxu1 %v5458_v29  ;;  %v5547_v28 = vld [vmem:[#allocation5 + $0xc20] ss:$16 sps:$4 sm:$0xff]   ;;  %v5550_v29 = vld [vmem:[#allocation5 + $0xc28] ss:$16 sps:$4 sm:$0xff]  }
 0x1a8   :  { %3458 = vmatprep.subr.bf16.mxu0 %v5463_v30  ;;  %3786 = vmatprep.subr.bf16.mxu1 %v5466_v31  ;;  %v5558_v30 = vld [vmem:[#allocation5 + $0xc4c] ss:$16 sps:$4 sm:$0xff]   ;;  %v5553_v31 = vld [vmem:[#allocation5 + $0xc40] ss:$16 sps:$4 sm:$0xff]  }
 0x1ab   :  { %3459 = vmatpush1.bf16.msra.mxu0 %v5461_v32  ;;  %3787 = vmatpush1.bf16.msra.mxu1 %v5464_v33  ;;  %v5556_v32 = vld [vmem:[#allocation5 + $0xc48] ss:$16 sps:$4 sm:$0xff]   ;;  %v5561_v33 = vld [vmem:[#allocation5 + $0xc64] ss:$16 sps:$4 sm:$0xff]  }
 0x1ac   :  { %3460 = vmatprep.subr.bf16.mxu0 %v5469_v34  ;;  %3788 = vmatprep.subr.bf16.mxu1 %v5472_v35  ;;  %v5564_v34 = vld [vmem:[#allocation5 + $0xc6c] ss:$16 sps:$4 sm:$0xff]   ;;  %v5559_v35 = vld [vmem:[#allocation5 + $0xc60] ss:$16 sps:$4 sm:$0xff]  }
 0x1af   :  { %3461 = vmatpush1.bf16.msra.mxu0 %v5467_v36  ;;  %3789 = vmatpush1.bf16.msra.mxu1 %v5470_v37  ;;  %v5562_v36 = vld [vmem:[#allocation5 + $0xc68] ss:$16 sps:$4 sm:$0xff]   ;;  %v5567_v37 = vld [vmem:[#allocation5 + $0xc84] ss:$16 sps:$4 sm:$0xff]  }
 0x1b0   :  { %3462 = vmatprep.subr.bf16.mxu0 %v5475_v38  ;;  %3790 = vmatprep.subr.bf16.mxu1 %v5478_v39  ;;  %v5570_v38 = vld [vmem:[#allocation5 + $0xc8c] ss:$16 sps:$4 sm:$0xff]   ;;  %v5565_v39 = vld [vmem:[#allocation5 + $0xc80] ss:$16 sps:$4 sm:$0xff]  }
 0x1b3   :  { %3463 = vmatpush1.bf16.msra.mxu0 %v5473_v40  ;;  %3791 = vmatpush1.bf16.msra.mxu1 %v5476_v41  ;;  %v5568_v40 = vld [vmem:[#allocation5 + $0xc88] ss:$16 sps:$4 sm:$0xff]   ;;  %v5573_v41 = vld [vmem:[#allocation5 + $0xca4] ss:$16 sps:$4 sm:$0xff]  }
 0x1b4   :  { %3464 = vmatprep.subr.bf16.mxu0 %v5481_v42  ;;  %3792 = vmatprep.subr.bf16.mxu1 %v5484_v43  ;;  %v5576_v42 = vld [vmem:[#allocation5 + $0xcac] ss:$16 sps:$4 sm:$0xff]   ;;  %v5571_v43 = vld [vmem:[#allocation5 + $0xca0] ss:$16 sps:$4 sm:$0xff]  }
 0x1b7   :  { %3465 = vmatpush1.bf16.msra.mxu0 %v5479_v44  ;;  %3793 = vmatpush1.bf16.msra.mxu1 %v5482_v45  ;;  %v5574_v44 = vld [vmem:[#allocation5 + $0xca8] ss:$16 sps:$4 sm:$0xff]   ;;  %v5579_v45 = vld [vmem:[#allocation5 + $0xcc4] ss:$16 sps:$4 sm:$0xff]  }
 0x1b8   :  { %3466 = vmatprep.subr.bf16.mxu0 %v5487_v46  ;;  %3794 = vmatprep.subr.bf16.mxu1 %v5490_v47  ;;  %v5582_v46 = vld [vmem:[#allocation5 + $0xccc] ss:$16 sps:$4 sm:$0xff]   ;;  %v5577_v47 = vld [vmem:[#allocation5 + $0xcc0] ss:$16 sps:$4 sm:$0xff]  }
 0x1bb   :  { %3467 = vmatpush1.bf16.msra.mxu0 %v5485_v48  ;;  %3795 = vmatpush1.bf16.msra.mxu1 %v5488_v49  ;;  %v5580_v48 = vld [vmem:[#allocation5 + $0xcc8] ss:$16 sps:$4 sm:$0xff]   ;;  %v5585_v49 = vld [vmem:[#allocation5 + $0xce4] ss:$16 sps:$4 sm:$0xff]  }
 0x1bc   :  { %3468 = vmatprep.subr.bf16.mxu0 %v5493_v50  ;;  %3796 = vmatprep.subr.bf16.mxu1 %v5496_v51  ;;  %v5588_v50 = vld [vmem:[#allocation5 + $0xcec] ss:$16 sps:$4 sm:$0xff]   ;;  %v5583_v51 = vld [vmem:[#allocation5 + $0xce0] ss:$16 sps:$4 sm:$0xff]  }
 0x1bf   :  { %3469 = vmatpush1.bf16.msra.mxu0 %v5491_v52  ;;  %3797 = vmatpush1.bf16.msra.mxu1 %v5494_v53  ;;  %v5586_v52 = vld [vmem:[#allocation5 + $0xce8] ss:$16 sps:$4 sm:$0xff]   ;;  %v5591_v53 = vld [vmem:[#allocation5 + $0xd04] ss:$16 sps:$4 sm:$0xff]  }
 0x1c0   :  { %3470 = vmatprep.subr.bf16.mxu0 %v5499_v54  ;;  %3798 = vmatprep.subr.bf16.mxu1 %v5502_v55  ;;  %v5594_v54 = vld [vmem:[#allocation5 + $0xd0c] ss:$16 sps:$4 sm:$0xff]   ;;  %v5589_v55 = vld [vmem:[#allocation5 + $0xd00] ss:$16 sps:$4 sm:$0xff]  }
 0x1c3   :  { %3471 = vmatpush1.bf16.msra.mxu0 %v5497_v56  ;;  %3799 = vmatpush1.bf16.msra.mxu1 %v5500_v57  ;;  %v5592_v56 = vld [vmem:[#allocation5 + $0xd08] ss:$16 sps:$4 sm:$0xff]   ;;  %v5597_v57 = vld [vmem:[#allocation5 + $0xd24] ss:$16 sps:$4 sm:$0xff]  }
 0x1c4   :  { %3472 = vmatprep.subr.bf16.mxu0 %v5505_v58  ;;  %3800 = vmatprep.subr.bf16.mxu1 %v5508_v59  ;;  %v5600_v58 = vld [vmem:[#allocation5 + $0xd2c] ss:$16 sps:$4 sm:$0xff]   ;;  %v5595_v59 = vld [vmem:[#allocation5 + $0xd20] ss:$16 sps:$4 sm:$0xff]  }
 0x1c7   :  { %3473 = vmatpush1.bf16.msra.mxu0 %v5503_v60  ;;  %3801 = vmatpush1.bf16.msra.mxu1 %v5506_v61  ;;  %v5598_v60 = vld [vmem:[#allocation5 + $0xd28] ss:$16 sps:$4 sm:$0xff]   ;;  %v5603_v61 = vld [vmem:[#allocation5 + $0xd44] ss:$16 sps:$4 sm:$0xff]  }
 0x1c8   :  { %3474 = vmatprep.subr.bf16.mxu0 %v5511_v62  ;;  %3802 = vmatprep.subr.bf16.mxu1 %v5514_v63  ;;  %v5606_v62 = vld [vmem:[#allocation5 + $0xd4c] ss:$16 sps:$4 sm:$0xff]   ;;  %v5601_v63 = vld [vmem:[#allocation5 + $0xd40] ss:$16 sps:$4 sm:$0xff]  }
 0x1cb   :  { %3475 = vmatpush1.bf16.msra.mxu0 %v5509_v0  ;;  %3803 = vmatpush1.bf16.msra.mxu1 %v5512_v1  ;;  %v5604_v0 = vld [vmem:[#allocation5 + $0xd48] ss:$16 sps:$4 sm:$0xff]   ;;  %v5609_v1 = vld [vmem:[#allocation5 + $0xd64] ss:$16 sps:$4 sm:$0xff]  }
 0x1cc   :  { %3476 = vmatprep.subr.bf16.mxu0 %v5517_v2  ;;  %3804 = vmatprep.subr.bf16.mxu1 %v5520_v3  ;;  %v5612_v2 = vld [vmem:[#allocation5 + $0xd6c] ss:$16 sps:$4 sm:$0xff]   ;;  %v5607_v3 = vld [vmem:[#allocation5 + $0xd60] ss:$16 sps:$4 sm:$0xff]  }
 0x1cf   :  { %3477 = vmatpush1.bf16.msra.mxu0 %v5515_v4  ;;  %3805 = vmatpush1.bf16.msra.mxu1 %v5518_v5  ;;  %v5610_v4 = vld [vmem:[#allocation5 + $0xd68] ss:$16 sps:$4 sm:$0xff]   ;;  %v5615_v5 = vld [vmem:[#allocation5 + $0xd84] ss:$16 sps:$4 sm:$0xff]  }
 0x1d0   :  { %3478 = vmatprep.subr.bf16.mxu0 %v5523_v6  ;;  %3806 = vmatprep.subr.bf16.mxu1 %v5526_v7  ;;  %v5618_v6 = vld [vmem:[#allocation5 + $0xd8c] ss:$16 sps:$4 sm:$0xff]   ;;  %v5613_v7 = vld [vmem:[#allocation5 + $0xd80] ss:$16 sps:$4 sm:$0xff]  }
 0x1d3   :  { %3479 = vmatpush1.bf16.msra.mxu0 %v5521_v8  ;;  %3807 = vmatpush1.bf16.msra.mxu1 %v5524_v9  ;;  %v5616_v8 = vld [vmem:[#allocation5 + $0xd88] ss:$16 sps:$4 sm:$0xff]   ;;  %v5621_v9 = vld [vmem:[#allocation5 + $0xda4] ss:$16 sps:$4 sm:$0xff]  }
 0x1d4   :  { %3480 = vmatprep.subr.bf16.mxu0 %v5529_v10  ;;  %3808 = vmatprep.subr.bf16.mxu1 %v5532_v11  ;;  %v5624_v10 = vld [vmem:[#allocation5 + $0xdac] ss:$16 sps:$4 sm:$0xff]   ;;  %v5619_v11 = vld [vmem:[#allocation5 + $0xda0] ss:$16 sps:$4 sm:$0xff]  }
 0x1d7   :  { %3481 = vmatpush1.bf16.msra.mxu0 %v5527_v13  ;;  %3809 = vmatpush1.bf16.msra.mxu1 %v5530_v14  ;;  %v5622_v13 = vld [vmem:[#allocation5 + $0xda8] ss:$16 sps:$4 sm:$0xff]   ;;  %v5627_v14 = vld [vmem:[#allocation5 + $0xdc4] ss:$16 sps:$4 sm:$0xff]  }
 0x1d8   :  { %3482 = vmatprep.subr.bf16.mxu0 %v5535_v16  ;;  %3810 = vmatprep.subr.bf16.mxu1 %v5538_v17  ;;  %v5630_v16 = vld [vmem:[#allocation5 + $0xdcc] ss:$16 sps:$4 sm:$0xff]   ;;  %v5625_v17 = vld [vmem:[#allocation5 + $0xdc0] ss:$16 sps:$4 sm:$0xff]  }
 0x1db   :  { %3483 = vmatpush1.bf16.msra.mxu0 %v5533_v19  ;;  %3811 = vmatpush1.bf16.msra.mxu1 %v5536_v21  ;;  %v5628_v19 = vld [vmem:[#allocation5 + $0xdc8] ss:$16 sps:$4 sm:$0xff]   ;;  %v5633_v21 = vld [vmem:[#allocation5 + $0xde4] ss:$16 sps:$4 sm:$0xff]  }
 0x1dc   :  { %3493 = vmatprep.subr.bf16.mxu0 %v5543_v12  ;;  %3821 = vmatprep.subr.bf16.mxu1 %v5546_v22  ;;  %v5636_v12 = vld [vmem:[#allocation5 + $0xdec] ss:$16 sps:$4 sm:$0xff]   ;;  %v5631_v22 = vld [vmem:[#allocation5 + $0xde0] ss:$16 sps:$4 sm:$0xff]  }
 0x1de   :  { %3485 = vmatmul.mubr.bf16.vlgmr.msra.gmra.mrb[0].mxu0 %v4289_v23  ;;  %3813 = vmatmul.mubr.bf16.vlgmr.msra.gmra.mrb[0].mxu1 %v4289_v23  ;;  %v5634_v23 = vld [vmem:[#allocation5 + $0xde8] ss:$16 sps:$4 sm:$0xff]  }
 0x1df   :  { %3494 = vmatpush1.bf16.msra.mxu0 %v5541_v24  ;;  %3822 = vmatpush1.bf16.msra.mxu1 %v5544_v25  ;;  %v5641_v24 = vld [vmem:[#allocation5 + $0xe04] ss:$16 sps:$4 sm:$0xff]   ;;  %v5644_v25 = vld [vmem:[#allocation5 + $0xe0c] ss:$16 sps:$4 sm:$0xff]  }
 0x1e0   :  { %3495 = vmatprep.subr.bf16.mxu0 %v5549_v26  ;;  %3823 = vmatprep.subr.bf16.mxu1 %v5552_v18  ;;  %v4291_v26 = vcombine.low %v6025_v15, %v6025_v15  ;;  %v6031_v18 = vld [vmem:[#allocation3 + $0x38] sm:$0xff]  ;;  %v5653_v15 = vld [vmem:[#allocation5 + $0xe44] ss:$16 sps:$4 sm:$0xff]  }
 0x1e1   :  { %3525 = vmatprep.mubr.bf16.mxu0 %v4292_v27  ;;  %3853 = vmatprep.mubr.bf16.mxu1 %v4292_v27  ;;  %v5639_v27 = vld [vmem:[#allocation5 + $0xe00] ss:$16 sps:$4 sm:$0xff]  }
 0x1e3   :  { %3496 = vmatpush1.bf16.msra.mxu0 %v5547_v28  ;;  %3824 = vmatpush1.bf16.msra.mxu1 %v5550_v29  ;;  %v5642_v28 = vld [vmem:[#allocation5 + $0xe08] ss:$16 sps:$4 sm:$0xff]   ;;  %v5647_v29 = vld [vmem:[#allocation5 + $0xe24] ss:$16 sps:$4 sm:$0xff]  }
 0x1e4   :  { %3497 = vmatprep.subr.bf16.mxu0 %v5555_v20  ;;  %3825 = vmatprep.subr.bf16.mxu1 %v5558_v30  ;;  %v5650_v20 = vld [vmem:[#allocation5 + $0xe2c] ss:$16 sps:$4 sm:$0xff]   ;;  %v4294_v30 = vcombine.high %v6031_v18, %v6031_v18 }
 0x1e7   :  { %3498 = vmatpush1.bf16.msra.mxu0 %v5553_v31  ;;  %3826 = vmatpush1.bf16.msra.mxu1 %v5556_v32  ;;  %v5645_v31 = vld [vmem:[#allocation5 + $0xe20] ss:$16 sps:$4 sm:$0xff]   ;;  %v5648_v32 = vld [vmem:[#allocation5 + $0xe28] ss:$16 sps:$4 sm:$0xff]  }
 0x1e8   :  { %3499 = vmatprep.subr.bf16.mxu0 %v5561_v33  ;;  %3827 = vmatprep.subr.bf16.mxu1 %v5564_v34  ;;  %v5656_v33 = vld [vmem:[#allocation5 + $0xe4c] ss:$16 sps:$4 sm:$0xff]   ;;  %v5651_v34 = vld [vmem:[#allocation5 + $0xe40] ss:$16 sps:$4 sm:$0xff]  }
 0x1eb   :  { %3500 = vmatpush1.bf16.msra.mxu0 %v5559_v35  ;;  %3828 = vmatpush1.bf16.msra.mxu1 %v5562_v36  ;;  %v5654_v35 = vld [vmem:[#allocation5 + $0xe48] ss:$16 sps:$4 sm:$0xff]   ;;  %v5659_v36 = vld [vmem:[#allocation5 + $0xe64] ss:$16 sps:$4 sm:$0xff]  }
 0x1ec   :  { %3501 = vmatprep.subr.bf16.mxu0 %v5567_v37  ;;  %3829 = vmatprep.subr.bf16.mxu1 %v5570_v38  ;;  %v5662_v37 = vld [vmem:[#allocation5 + $0xe6c] ss:$16 sps:$4 sm:$0xff]   ;;  %v5657_v38 = vld [vmem:[#allocation5 + $0xe60] ss:$16 sps:$4 sm:$0xff]  }
 0x1ef   :  { %3502 = vmatpush1.bf16.msra.mxu0 %v5565_v39  ;;  %3830 = vmatpush1.bf16.msra.mxu1 %v5568_v40  ;;  %v5660_v39 = vld [vmem:[#allocation5 + $0xe68] ss:$16 sps:$4 sm:$0xff]   ;;  %v5665_v40 = vld [vmem:[#allocation5 + $0xe84] ss:$16 sps:$4 sm:$0xff]  }
 0x1f0   :  { %3503 = vmatprep.subr.bf16.mxu0 %v5573_v41  ;;  %3831 = vmatprep.subr.bf16.mxu1 %v5576_v42  ;;  %v5668_v41 = vld [vmem:[#allocation5 + $0xe8c] ss:$16 sps:$4 sm:$0xff]   ;;  %v5663_v42 = vld [vmem:[#allocation5 + $0xe80] ss:$16 sps:$4 sm:$0xff]  }
 0x1f3   :  { %3504 = vmatpush1.bf16.msra.mxu0 %v5571_v43  ;;  %3832 = vmatpush1.bf16.msra.mxu1 %v5574_v44  ;;  %v5666_v43 = vld [vmem:[#allocation5 + $0xe88] ss:$16 sps:$4 sm:$0xff]   ;;  %v5671_v44 = vld [vmem:[#allocation5 + $0xea4] ss:$16 sps:$4 sm:$0xff]  }
 0x1f4   :  { %3505 = vmatprep.subr.bf16.mxu0 %v5579_v45  ;;  %3833 = vmatprep.subr.bf16.mxu1 %v5582_v46  ;;  %v5674_v45 = vld [vmem:[#allocation5 + $0xeac] ss:$16 sps:$4 sm:$0xff]   ;;  %v5669_v46 = vld [vmem:[#allocation5 + $0xea0] ss:$16 sps:$4 sm:$0xff]  }
 0x1f7   :  { %3506 = vmatpush1.bf16.msra.mxu0 %v5577_v47  ;;  %3834 = vmatpush1.bf16.msra.mxu1 %v5580_v48  ;;  %v5672_v47 = vld [vmem:[#allocation5 + $0xea8] ss:$16 sps:$4 sm:$0xff]   ;;  %v5677_v48 = vld [vmem:[#allocation5 + $0xec4] ss:$16 sps:$4 sm:$0xff]  }
 0x1f8   :  { %3507 = vmatprep.subr.bf16.mxu0 %v5585_v49  ;;  %3835 = vmatprep.subr.bf16.mxu1 %v5588_v50  ;;  %v5680_v49 = vld [vmem:[#allocation5 + $0xecc] ss:$16 sps:$4 sm:$0xff]   ;;  %v5675_v50 = vld [vmem:[#allocation5 + $0xec0] ss:$16 sps:$4 sm:$0xff]  }
 0x1fb   :  { %3508 = vmatpush1.bf16.msra.mxu0 %v5583_v51  ;;  %3836 = vmatpush1.bf16.msra.mxu1 %v5586_v52  ;;  %v5678_v51 = vld [vmem:[#allocation5 + $0xec8] ss:$16 sps:$4 sm:$0xff]   ;;  %v5683_v52 = vld [vmem:[#allocation5 + $0xee4] ss:$16 sps:$4 sm:$0xff]  }
 0x1fc   :  { %3509 = vmatprep.subr.bf16.mxu0 %v5591_v53  ;;  %3837 = vmatprep.subr.bf16.mxu1 %v5594_v54  ;;  %v5686_v53 = vld [vmem:[#allocation5 + $0xeec] ss:$16 sps:$4 sm:$0xff]   ;;  %v5681_v54 = vld [vmem:[#allocation5 + $0xee0] ss:$16 sps:$4 sm:$0xff]  }
 0x1ff   :  { %3510 = vmatpush1.bf16.msra.mxu0 %v5589_v55  ;;  %3838 = vmatpush1.bf16.msra.mxu1 %v5592_v56  ;;  %v5684_v55 = vld [vmem:[#allocation5 + $0xee8] ss:$16 sps:$4 sm:$0xff]   ;;  %v5689_v56 = vld [vmem:[#allocation5 + $0xf04] ss:$16 sps:$4 sm:$0xff]  }
 0x200   :  { %3511 = vmatprep.subr.bf16.mxu0 %v5597_v57  ;;  %3839 = vmatprep.subr.bf16.mxu1 %v5600_v58  ;;  %v5692_v57 = vld [vmem:[#allocation5 + $0xf0c] ss:$16 sps:$4 sm:$0xff]   ;;  %v5687_v58 = vld [vmem:[#allocation5 + $0xf00] ss:$16 sps:$4 sm:$0xff]  }
 0x203   :  { %3512 = vmatpush1.bf16.msra.mxu0 %v5595_v59  ;;  %3840 = vmatpush1.bf16.msra.mxu1 %v5598_v60  ;;  %v5690_v59 = vld [vmem:[#allocation5 + $0xf08] ss:$16 sps:$4 sm:$0xff]   ;;  %v5695_v60 = vld [vmem:[#allocation5 + $0xf24] ss:$16 sps:$4 sm:$0xff]  }
 0x204   :  { %3513 = vmatprep.subr.bf16.mxu0 %v5603_v61  ;;  %3841 = vmatprep.subr.bf16.mxu1 %v5606_v62  ;;  %v5698_v61 = vld [vmem:[#allocation5 + $0xf2c] ss:$16 sps:$4 sm:$0xff]   ;;  %v5693_v62 = vld [vmem:[#allocation5 + $0xf20] ss:$16 sps:$4 sm:$0xff]  }
 0x207   :  { %3514 = vmatpush1.bf16.msra.mxu0 %v5601_v63  ;;  %3842 = vmatpush1.bf16.msra.mxu1 %v5604_v0  ;;  %v5696_v63 = vld [vmem:[#allocation5 + $0xf28] ss:$16 sps:$4 sm:$0xff]   ;;  %v5701_v0 = vld [vmem:[#allocation5 + $0xf44] ss:$16 sps:$4 sm:$0xff]  }
 0x208   :  { %3515 = vmatprep.subr.bf16.mxu0 %v5609_v1  ;;  %3843 = vmatprep.subr.bf16.mxu1 %v5612_v2  ;;  %v5704_v1 = vld [vmem:[#allocation5 + $0xf4c] ss:$16 sps:$4 sm:$0xff]   ;;  %v5699_v2 = vld [vmem:[#allocation5 + $0xf40] ss:$16 sps:$4 sm:$0xff]  }
 0x20b   :  { %3516 = vmatpush1.bf16.msra.mxu0 %v5607_v3  ;;  %3844 = vmatpush1.bf16.msra.mxu1 %v5610_v4  ;;  %v5702_v3 = vld [vmem:[#allocation5 + $0xf48] ss:$16 sps:$4 sm:$0xff]   ;;  %v5707_v4 = vld [vmem:[#allocation5 + $0xf64] ss:$16 sps:$4 sm:$0xff]  }
 0x20c   :  { %3517 = vmatprep.subr.bf16.mxu0 %v5615_v5  ;;  %3845 = vmatprep.subr.bf16.mxu1 %v5618_v6  ;;  %v5710_v5 = vld [vmem:[#allocation5 + $0xf6c] ss:$16 sps:$4 sm:$0xff]   ;;  %v5705_v6 = vld [vmem:[#allocation5 + $0xf60] ss:$16 sps:$4 sm:$0xff]  }
 0x20f   :  { %3518 = vmatpush1.bf16.msra.mxu0 %v5613_v7  ;;  %3846 = vmatpush1.bf16.msra.mxu1 %v5616_v8  ;;  %v5708_v7 = vld [vmem:[#allocation5 + $0xf68] ss:$16 sps:$4 sm:$0xff]   ;;  %v5713_v8 = vld [vmem:[#allocation5 + $0xf84] ss:$16 sps:$4 sm:$0xff]  }
 0x210   :  { %3519 = vmatprep.subr.bf16.mxu0 %v5621_v9  ;;  %3847 = vmatprep.subr.bf16.mxu1 %v5624_v10  ;;  %v5716_v9 = vld [vmem:[#allocation5 + $0xf8c] ss:$16 sps:$4 sm:$0xff]   ;;  %v5711_v10 = vld [vmem:[#allocation5 + $0xf80] ss:$16 sps:$4 sm:$0xff]  }
 0x213   :  { %3520 = vmatpush1.bf16.msra.mxu0 %v5619_v11  ;;  %3848 = vmatpush1.bf16.msra.mxu1 %v5622_v13  ;;  %v5714_v11 = vld [vmem:[#allocation5 + $0xf88] ss:$16 sps:$4 sm:$0xff]   ;;  %v5719_v13 = vld [vmem:[#allocation5 + $0xfa4] ss:$16 sps:$4 sm:$0xff]  }
 0x214   :  { %3521 = vmatprep.subr.bf16.mxu0 %v5627_v14  ;;  %3849 = vmatprep.subr.bf16.mxu1 %v5630_v16  ;;  %v5722_v14 = vld [vmem:[#allocation5 + $0xfac] ss:$16 sps:$4 sm:$0xff]   ;;  %v5717_v16 = vld [vmem:[#allocation5 + $0xfa0] ss:$16 sps:$4 sm:$0xff]  }
 0x217   :  { %3522 = vmatpush1.bf16.msra.mxu0 %v5625_v17  ;;  %3850 = vmatpush1.bf16.msra.mxu1 %v5628_v19  ;;  %v5720_v17 = vld [vmem:[#allocation5 + $0xfa8] ss:$16 sps:$4 sm:$0xff]   ;;  %v5725_v19 = vld [vmem:[#allocation5 + $0xfc4] ss:$16 sps:$4 sm:$0xff]  }
 0x218   :  { %3523 = vmatprep.subr.bf16.mxu0 %v5633_v21  ;;  %3851 = vmatprep.subr.bf16.mxu1 %v5636_v12  ;;  %v5728_v21 = vld [vmem:[#allocation5 + $0xfcc] ss:$16 sps:$4 sm:$0xff]   ;;  %v5723_v12 = vld [vmem:[#allocation5 + $0xfc0] ss:$16 sps:$4 sm:$0xff]  }
 0x21b   :  { %3524 = vmatpush1.bf16.msra.mxu0 %v5631_v22  ;;  %3852 = vmatpush1.bf16.msra.mxu1 %v5634_v23  ;;  %v5726_v22 = vld [vmem:[#allocation5 + $0xfc8] ss:$16 sps:$4 sm:$0xff]   ;;  %v5731_v23 = vld [vmem:[#allocation5 + $0xfe4] ss:$16 sps:$4 sm:$0xff]  }
 0x21c   :  { %3534 = vmatprep.subr.bf16.mxu0 %v5641_v24  ;;  %3862 = vmatprep.subr.bf16.mxu1 %v5644_v25  ;;  %v5734_v24 = vld [vmem:[#allocation5 + $0xfec] ss:$16 sps:$4 sm:$0xff]   ;;  %v5729_v25 = vld [vmem:[#allocation5 + $0xfe0] ss:$16 sps:$4 sm:$0xff]  }
 0x21e   :  { %3526 = vmatmul.mubr.bf16.vlgmr.msra.gmra.mrb[0].mxu0 %v4291_v26  ;;  %3854 = vmatmul.mubr.bf16.vlgmr.msra.gmra.mrb[0].mxu1 %v4291_v26  ;;  %v5732_v26 = vld [vmem:[#allocation5 + $0xfe8] ss:$16 sps:$4 sm:$0xff]  }
 0x21f   :  { %3535 = vmatpush1.bf16.msra.mxu0 %v5639_v27  ;;  %3863 = vmatpush1.bf16.msra.mxu1 %v5642_v28  ;;  %v5737_v27 = vld [vmem:[%s6139_s3 + $0x40] sm:$0xff]  }
 0x220   :  { %3536 = vmatprep.subr.bf16.mxu0 %v5647_v29  ;;  %3864 = vmatprep.subr.bf16.mxu1 %v5650_v20  ;;  %v5738_v28 = vld [vmem:[%s6139_s3 + $0xc0] sm:$0xff]   ;;  %v4293_v29 = vcombine.low %v6031_v18, %v6031_v18  ;;  %v5742_v18 = vld [vmem:[%s6139_s3 + $0xc8] sm:$0xff]  }
 0x221   :  { %3566 = vmatprep.mubr.bf16.mxu0 %v4294_v30  ;;  %3894 = vmatprep.mubr.bf16.mxu1 %v4294_v30  ;;  %v5739_v20 = vld [vmem:[%s6139_s3] sm:$0xff]  }
 0x222   :  { %v5740_v30 = vld [vmem:[%s6139_s3 + $0x80] sm:$0xff]  }
 0x223   :  { %3537 = vmatpush1.bf16.msra.mxu0 %v5645_v31  ;;  %3865 = vmatpush1.bf16.msra.mxu1 %v5648_v32  ;;  %v5741_v31 = vld [vmem:[%s6139_s3 + $0x48] sm:$0xff]  }
 0x224   :  { %3538 = vmatprep.subr.bf16.mxu0 %v5653_v15  ;;  %3866 = vmatprep.subr.bf16.mxu1 %v5656_v33  ;;  %v5743_v32 = vld [vmem:[%s6139_s3 + $0x8] sm:$0xff]   ;;  %v5745_v33 = vld [vmem:[%s6139_s3 + $0x50] sm:$0xff]  }
 0x225   :  { %v5744_v15 = vld [vmem:[%s6139_s3 + $0x88] sm:$0xff]  }
 0x227   :  { %3539 = vmatpush1.bf16.msra.mxu0 %v5651_v34  ;;  %3867 = vmatpush1.bf16.msra.mxu1 %v5654_v35  ;;  %v5746_v34 = vld [vmem:[%s6139_s3 + $0xd0] sm:$0xff]  }
 0x228   :  { %3540 = vmatprep.subr.bf16.mxu0 %v5659_v36  ;;  %3868 = vmatprep.subr.bf16.mxu1 %v5662_v37  ;;  %v5747_v35 = vld [vmem:[%s6139_s3 + $0x10] sm:$0xff]   ;;  %v5749_v37 = vld [vmem:[%s6139_s3 + $0x58] sm:$0xff]  }
 0x229   :  { %v5748_v36 = vld [vmem:[%s6139_s3 + $0x90] sm:$0xff]  }
 0x22b   :  { %3541 = vmatpush1.bf16.msra.mxu0 %v5657_v38  ;;  %3869 = vmatpush1.bf16.msra.mxu1 %v5660_v39  ;;  %v5750_v38 = vld [vmem:[%s6139_s3 + $0xd8] sm:$0xff]  }
 0x22c   :  { %3542 = vmatprep.subr.bf16.mxu0 %v5665_v40  ;;  %3870 = vmatprep.subr.bf16.mxu1 %v5668_v41  ;;  %v5751_v39 = vld [vmem:[%s6139_s3 + $0x18] sm:$0xff]   ;;  %v5753_v41 = vld [vmem:[%s6139_s3 + $0x60] sm:$0xff]  }
 0x22d   :  { %v5752_v40 = vld [vmem:[%s6139_s3 + $0x98] sm:$0xff]  }
 0x22f   :  { %3543 = vmatpush1.bf16.msra.mxu0 %v5663_v42  ;;  %3871 = vmatpush1.bf16.msra.mxu1 %v5666_v43  ;;  %v5754_v42 = vld [vmem:[%s6139_s3 + $0xe0] sm:$0xff]  }
 0x230   :  { %3544 = vmatprep.subr.bf16.mxu0 %v5671_v44  ;;  %3872 = vmatprep.subr.bf16.mxu1 %v5674_v45  ;;  %v5755_v43 = vld [vmem:[%s6139_s3 + $0x20] sm:$0xff]   ;;  %v5757_v45 = vld [vmem:[%s6139_s3 + $0x68] sm:$0xff]  }
 0x231   :  { %v5756_v44 = vld [vmem:[%s6139_s3 + $0xa0] sm:$0xff]  }
 0x233   :  { %3545 = vmatpush1.bf16.msra.mxu0 %v5669_v46  ;;  %3873 = vmatpush1.bf16.msra.mxu1 %v5672_v47  ;;  %v5758_v46 = vld [vmem:[%s6139_s3 + $0xe8] sm:$0xff]  }
 0x234   :  { %3546 = vmatprep.subr.bf16.mxu0 %v5677_v48  ;;  %3874 = vmatprep.subr.bf16.mxu1 %v5680_v49  ;;  %v5759_v47 = vld [vmem:[%s6139_s3 + $0x28] sm:$0xff]   ;;  %v5761_v49 = vld [vmem:[%s6139_s3 + $0x70] sm:$0xff]  }
 0x235   :  { %v5760_v48 = vld [vmem:[%s6139_s3 + $0xa8] sm:$0xff]  }
 0x237   :  { %3547 = vmatpush1.bf16.msra.mxu0 %v5675_v50  ;;  %3875 = vmatpush1.bf16.msra.mxu1 %v5678_v51  ;;  %v5762_v50 = vld [vmem:[%s6139_s3 + $0xf0] sm:$0xff]  }
 0x238   :  { %3548 = vmatprep.subr.bf16.mxu0 %v5683_v52  ;;  %3876 = vmatprep.subr.bf16.mxu1 %v5686_v53  ;;  %v5763_v51 = vld [vmem:[%s6139_s3 + $0x30] sm:$0xff]   ;;  %v5765_v53 = vld [vmem:[%s6139_s3 + $0x78] sm:$0xff]  }
 0x239   :  { %v5764_v52 = vld [vmem:[%s6139_s3 + $0xb0] sm:$0xff]  }
 0x23b   :  { %3549 = vmatpush1.bf16.msra.mxu0 %v5681_v54  ;;  %3877 = vmatpush1.bf16.msra.mxu1 %v5684_v55  ;;  %v5766_v54 = vld [vmem:[%s6139_s3 + $0xf8] sm:$0xff]  }
 0x23c   :  { %3550 = vmatprep.subr.bf16.mxu0 %v5689_v56  ;;  %3878 = vmatprep.subr.bf16.mxu1 %v5692_v57  ;;  %v5767_v55 = vld [vmem:[%s6139_s3 + $0x38] sm:$0xff]   ;;  %v611_v57 = vlaneseq }
 0x23d   :  { %v5768_v56 = vld [vmem:[%s6139_s3 + $0xb8] sm:$0xff]  }
 0x23f   :  { %3551 = vmatpush1.bf16.msra.mxu0 %v5687_v58  ;;  %3879 = vmatpush1.bf16.msra.mxu1 %v5690_v59  ;;  %v612_v58 = vshrl.u32 %v611_v57, 7 }
 0x240   :  { %3552 = vmatprep.subr.bf16.mxu0 %v5695_v60  ;;  %3880 = vmatprep.subr.bf16.mxu1 %v5698_v61  ;;  %v609_v61 = vld [vmem:[#allocation7] sm:$0xf] }
 0x241   :  { %v613_v59 = vsub.s32 0, %v612_v58  ;;  %v621_v60 = vsub.s32 2, %v612_v58 }
 0x243   :  { %3553 = vmatpush1.bf16.msra.mxu0 %v5693_v62  ;;  %3881 = vmatpush1.bf16.msra.mxu1 %v5696_v63  ;;  %v617_v62 = vsub.s32 1, %v612_v58  ;;  %v625_v63 = vsub.s32 3, %v612_v58 }
 0x244   :  { %3554 = vmatprep.subr.bf16.mxu0 %v5701_v0  ;;  %3882 = vmatprep.subr.bf16.mxu1 %v5704_v1  ;;  %v614_v0 = vrot.slane %v609_v61, %v613_v59  ;;  %v622_v1 = vrot.slane %v609_v61, %v621_v60 }
 0x247   :  { %3555 = vmatpush1.bf16.msra.mxu0 %v5699_v2  ;;  %3883 = vmatpush1.bf16.msra.mxu1 %v5702_v3  ;;  %v618_v2 = vrot.slane %v609_v61, %v617_v62  ;;  %v626_v3 = vrot.slane %v609_v61, %v625_v63 }
 0x248   :  { %3556 = vmatprep.subr.bf16.mxu0 %v5707_v4  ;;  %3884 = vmatprep.subr.bf16.mxu1 %v5710_v5 }
 0x24b   :  { %3557 = vmatpush1.bf16.msra.mxu0 %v5705_v6  ;;  %3885 = vmatpush1.bf16.msra.mxu1 %v5708_v7 }
 0x24c   :  { %3558 = vmatprep.subr.bf16.mxu0 %v5713_v8  ;;  %3886 = vmatprep.subr.bf16.mxu1 %v5716_v9 }
 0x24f   :  { %3559 = vmatpush1.bf16.msra.mxu0 %v5711_v10  ;;  %3887 = vmatpush1.bf16.msra.mxu1 %v5714_v11 }
 0x250   :  { %3560 = vmatprep.subr.bf16.mxu0 %v5719_v13  ;;  %3888 = vmatprep.subr.bf16.mxu1 %v5722_v14 }
 0x253   :  { %3561 = vmatpush1.bf16.msra.mxu0 %v5717_v16  ;;  %3889 = vmatpush1.bf16.msra.mxu1 %v5720_v17 }
 0x254   :  { %3562 = vmatprep.subr.bf16.mxu0 %v5725_v19  ;;  %3890 = vmatprep.subr.bf16.mxu1 %v5728_v21 }
 0x257   :  { %3563 = vmatpush1.bf16.msra.mxu0 %v5723_v12  ;;  %3891 = vmatpush1.bf16.msra.mxu1 %v5726_v22 }
 0x258   :  { %3564 = vmatprep.subr.bf16.mxu0 %v5731_v23  ;;  %3892 = vmatprep.subr.bf16.mxu1 %v5734_v24 }
 0x25b   :  { %3565 = vmatpush1.bf16.msra.mxu0 %v5729_v25  ;;  %3893 = vmatpush1.bf16.msra.mxu1 %v5732_v26  ;;  %v4807_v25 = vld [vmem:[#allocation8] ss:$0 sm:$0xff] }
 0x25c   :  { %4842 = vmatprep.subr.bf16.mxu0 %v5737_v27  ;;  %4864 = vmatprep.subr.bf16.mxu1 %v5738_v28 }
 0x25e   :  { %3567 = vmatmul.mubr.bf16.vlgmr.msra.gmra.mrb[0].mxu0 %v4293_v29  ;;  %3895 = vmatmul.mubr.bf16.vlgmr.msra.gmra.mrb[0].mxu1 %v4293_v29 }
 0x25f   :  { %4843 = vmatpush3.bf16.msra.mxu0 %v5739_v20  ;;  %4865 = vmatpush3.bf16.msra.mxu1 %v5740_v30 }
 0x260   :  { %4844 = vmatprep.subr.bf16.mxu0 %v5741_v31  ;;  %4866 = vmatprep.subr.bf16.mxu1 %v5742_v18 }
 0x263   :  { %4845 = vmatpush3.bf16.msra.mxu0 %v5743_v32  ;;  %4867 = vmatpush3.bf16.msra.mxu1 %v5744_v15  ;;  %v4840_v15 = vld [vmem:[#allocation10] ss:$0 sm:$0xff] }
 0x264   :  { %4846 = vmatprep.subr.bf16.mxu0 %v5745_v33  ;;  %4868 = vmatprep.subr.bf16.mxu1 %v5746_v34 }
 0x267   :  { %4847 = vmatpush3.bf16.msra.mxu0 %v5747_v35  ;;  %4869 = vmatpush3.bf16.msra.mxu1 %v5748_v36  ;;  %v4841_v36 = vld [vmem:[#allocation2] ss:$0 sm:$0xff] }
 0x268   :  { %4848 = vmatprep.subr.bf16.mxu0 %v5749_v37  ;;  %4870 = vmatprep.subr.bf16.mxu1 %v5750_v38 }
 0x26b   :  { %4849 = vmatpush3.bf16.msra.mxu0 %v5751_v39  ;;  %4871 = vmatpush3.bf16.msra.mxu1 %v5752_v40 }
 0x26c   :  { %4850 = vmatprep.subr.bf16.mxu0 %v5753_v41  ;;  %4872 = vmatprep.subr.bf16.mxu1 %v5754_v42 }
 0x26f   :  { %4851 = vmatpush3.bf16.msra.mxu0 %v5755_v43  ;;  %4873 = vmatpush3.bf16.msra.mxu1 %v5756_v44 }
 0x270   :  { %4852 = vmatprep.subr.bf16.mxu0 %v5757_v45  ;;  %4874 = vmatprep.subr.bf16.mxu1 %v5758_v46 }
 0x273   :  { %4853 = vmatpush3.bf16.msra.mxu0 %v5759_v47  ;;  %4875 = vmatpush3.bf16.msra.mxu1 %v5760_v48 }
 0x274   :  { %4854 = vmatprep.subr.bf16.mxu0 %v5761_v49  ;;  %4876 = vmatprep.subr.bf16.mxu1 %v5762_v50 }
 0x277   :  { %4855 = vmatpush3.bf16.msra.mxu0 %v5763_v51  ;;  %4877 = vmatpush3.bf16.msra.mxu1 %v5764_v52 }
 0x278   :  { %4856 = vmatprep.subr.bf16.mxu0 %v5765_v53  ;;  %4878 = vmatprep.subr.bf16.mxu1 %v5766_v54 }
 0x27b   :  { %4857 = vmatpush3.bf16.msra.mxu0 %v5767_v55  ;;  %4879 = vmatpush3.bf16.msra.mxu1 %v5768_v56 }
 0x331   :  { %v3568_v4 = vpop.f32.mrb[0].mxu0  ;;  %v3896_v5 = vpop.f32.mrb[0].mxu1 }
 0x332   :  { %v4886_v6 = vadd.f32 %v3568_v4, %v614_v0  ;;  %v4888_v7 = vadd.f32 %v3896_v5, %v622_v1  ;;  %v3570_v8 = vpop.f32.mrb[1].mxu0  ;;  %v3898_v9 = vpop.f32.mrb[1].mxu1 }
 0x333   :  { %v4887_v10 = vadd.f32 %v3570_v8, %v618_v2  ;;  %v4889_v11 = vadd.f32 %v3898_v9, %v626_v3  ;;  %v3572_v13 = vpop.f32.mrb[2].mxu0  ;;  %v3900_v14 = vpop.f32.mrb[2].mxu1 }
 0x334   :  { %v3573_v16 = vpop.f32.mrb[3].mxu0  ;;  %v3901_v17 = vpop.f32.mrb[3].mxu1  ;;  %v3903_v12 = vpack.c.bf16 %v4886_v6, %v4886_v6  ;;  %v3905_v22 = vpack.c.bf16 %v4888_v7, %v4888_v7 }
 0x335   :  { %v3904_v19 = vpack.c.bf16 %v4887_v10, %v4887_v10  ;;  %v3906_v21 = vpack.c.bf16 %v4889_v11, %v4889_v11 }
 0x337   :  { %4202 = vmatprep.mubr.bf16.mxu0 %v3904_v19  ;;  %4242 = vmatprep.mubr.bf16.mxu1 %v3906_v21 }
 0x338   :  { %4203 = vmatmul.mubr.bf16.vlgmr.msra.gmra.mrb[4].mxu0 %v3903_v12  ;;  %4243 = vmatmul.mubr.bf16.vlgmr.msra.gmra.mrb[4].mxu1 %v3905_v22 }
 0x40b   :  { %v4858_v23 = vpop.f32.mrb[4].mxu0  ;;  %v4880_v24 = vpop.f32.mrb[4].mxu1 }
 0x40c   :  { %v4859_v26 = vpop.f32.mrb[5].mxu0  ;;  %v4881_v27 = vpop.f32.mrb[5].mxu1 }
 0x40d   :  { %v4860_v28 = vadd.f32 %v4859_v26, %v4858_v23  ;;  %v4882_v29 = vadd.f32 %v4881_v27, %v4880_v24  ;;  %v4861_v20 = vpop.f32.mrb[6].mxu0  ;;  %v4883_v30 = vpop.f32.mrb[6].mxu1 }
 0x40e   :  { %v4862_v31 = vpop.f32.mrb[7].mxu0  ;;  %v4884_v18 = vpop.f32.mrb[7].mxu1 }
 0x40f   :  { %v4205_v32 = vadd.f32 %v4860_v28, %v4807_v25 }
 0x411   :  { %v4245_v33 = vadd.f32 %v4882_v29, %v4205_v32 }
 0x413   :  { %v4257_v34 = vmul.f32 %v4840_v15, %v4245_v33 }
 0x415   :  { %v4259_v35 = vsel %vm4258_vm0, %v4257_v34, 0.0 }
 0x416   :  { %4260 = vadd.xlane.f32.xlu0 %v4259_v35 }
 0x4a3   :  { %v4261_v37 = vpop.xlane.xlu0 %4260 }
 0x4a4   :  { %v4269_v38 = vadd.f32 %v4841_v36, %v4261_v37 }
 0x4a6   :  { %4271 = vst.msk [vmem:[%s6143_s7] sm:$0xff] %vm4270_vm1, %v4269_v38 }
 0x4a7   :  { %4276 = vsyncpa [#allocation4], 1 }
 0x4a8   :  { %4277 = vsyncpa [#allocation6], 1 }
 0x4a9   :  { %4278 = vsyncpa [#allocation9], 1 }

</bundles_post_ra>
